<compile_context>
chip_gen: v6e
topology: v6e:2x2x1
jax: 0.10.0
libtpu: 0.0.40
codegen_flags: <defaults>
</compile_context>

<pallas_src>
import functools

import jax
import jax.numpy as jnp
from jax.experimental import pallas as pl
from jax.experimental.pallas import tpu as pltpu


def _layer_norm_f32(v, gamma, beta, eps, n_true, mask):
    """LayerNorm over the last axis; statistics over the first n_true lanes only."""
    if mask is not None:
        v = v * mask
        mu = jnp.sum(v, axis=-1, keepdims=True) * (1.0 / n_true)
        d = (v - mu) * mask
    else:
        mu = jnp.mean(v, axis=-1, keepdims=True)
        d = v - mu
    var = jnp.sum(d * d, axis=-1, keepdims=True) * (1.0 / n_true)
    return d * jax.lax.rsqrt(var + eps) * gamma + beta


def pat_block_kernel(
    xq_ref, xkv_ref,
    wq_ref, bq_ref, wk_ref, bk_ref, wv_ref, bv_ref,
    wo_ref, bo_ref,
    g1_ref, be1_ref,
    w1_ref, b1_ref, w2_ref, b2_ref,
    g2_ref, be2_ref,
    o_ref,
    kT_scr, v_scr,
    *, num_heads, e_pad, e_true, scale, eps, compute_dtype,
):
    H, Ep = num_heads, e_pad

    # ---- K / V projection: once per batch element, cached in VMEM scratch.
    #      Relies on grid axis 1 (seq tiles) running sequentially ("arbitrary") so the
    #      scratch persists across the query tiles of one batch element. ----
    @pl.when(pl.program_id(1) == 0)
    def _():
        xkv = xkv_ref[0].astype(compute_dtype)                         # (S, Ep)
        k = jnp.dot(xkv, wk_ref[...],
                    preferred_element_type=jnp.float32) + bk_ref[...]  # (S, H*Ep)
        v = jnp.dot(xkv, wv_ref[...],
                    preferred_element_type=jnp.float32) + bv_ref[...]  # (S, H*Ep)
        for h in range(H):                                             # static unroll
            sl = slice(h * Ep, (h + 1) * Ep)
            kT_scr[h] = k[:, sl].T.astype(compute_dtype)               # (Ep, S), pre-T
            v_scr[h] = v[:, sl].astype(compute_dtype)                  # (S, Ep)

    xq = xq_ref[0]                                                     # (TQ, Ep)

    # Q projection: one lane-dense (TQ,Ep)@(Ep,H*Ep) matmul; 1/sqrt(E) folded into q.
    q = (jnp.dot(xq.astype(compute_dtype), wq_ref[...],
                 preferred_element_type=jnp.float32) + bq_ref[...]) * scale
    q = q.astype(compute_dtype)                                        # (TQ, H*Ep)

    # Per-head attention (static unroll): scores/softmax in f32, exact divide.
    ctx_parts = []
    for h in range(H):
        q_h = q[:, h * Ep:(h + 1) * Ep]                                # (TQ, Ep)
        s = jnp.dot(q_h, kT_scr[h], preferred_element_type=jnp.float32)   # (TQ, S)
        s = s - jnp.max(s, axis=-1, keepdims=True)
        p = jnp.exp(s)
        p = p / jnp.sum(p, axis=-1, keepdims=True)
        ctx_parts.append(
            jnp.dot(p.astype(compute_dtype), v_scr[h],
                    preferred_element_type=jnp.float32).astype(compute_dtype))
    ctx = jnp.concatenate(ctx_parts, axis=-1)                          # (TQ, H*Ep)

    # Output projection: single (TQ,H*Ep)@(H*Ep,Ep) matmul (head-sum in MXU K dim).
    attn = jnp.dot(ctx, wo_ref[...],
                   preferred_element_type=jnp.float32) + bo_ref[...]   # (TQ, Ep) f32

    # Lane mask for padded embedding columns (trace-time constant choice).
    if Ep != e_true:
        mask = (jax.lax.broadcasted_iota(jnp.int32, (1, Ep), 1) < e_true
                ).astype(jnp.float32)
    else:
        mask = None

    # Residual + LayerNorm 1 (f32 statistics over the true width).
    x1 = _layer_norm_f32(xq.astype(jnp.float32) + attn,
                         g1_ref[...], be1_ref[...], eps, e_true, mask)

    # Feed-forward (bf16 operands, f32 accumulation), tiled over TQ.
    h1 = jnp.dot(x1.astype(compute_dtype), w1_ref[...],
                 preferred_element_type=jnp.float32) + b1_ref[...]     # (TQ, Fp)
    h1 = jnp.maximum(h1, 0.0).astype(compute_dtype)
    ff = jnp.dot(h1, w2_ref[...],
                 preferred_element_type=jnp.float32) + b2_ref[...]     # (TQ, Ep)

    # Residual + LayerNorm 2, cast at store.
    x2 = _layer_norm_f32(x1 + ff, g2_ref[...], be2_ref[...], eps, e_true, mask)
    o_ref[0] = x2.astype(o_ref.dtype)


def _round_up(n, m):
    return ((n + m - 1) // m) * m


def _pick_q_tile(seq_len, q_tile):
    if seq_len <= q_tile:
        return seq_len
    for t in range(min(q_tile, seq_len), 7, -1):
        if seq_len % t == 0 and t % 8 == 0:
            return t
    return seq_len


def pat_block_forward(x, params, *, num_heads, eps=1e-6, q_tile=256,
                      compute_dtype=None):
    B, S, E = x.shape
    H = num_heads
    F = params["w1"].shape[1]
    if compute_dtype is None:
        compute_dtype = jnp.bfloat16 if x.dtype == jnp.float32 else x.dtype
    cdt = compute_dtype

    # ---- pad lane dims (embed, per-head, ff) to multiples of 128 (lane density) ----
    LANE = 128
    Ep = _round_up(E, LANE)
    Fp = _round_up(F, LANE)

    def pad2(a, rows, cols, dtype):
        a = jnp.asarray(a, jnp.float32)
        a = jnp.pad(a, ((0, rows - a.shape[0]), (0, cols - a.shape[1])))
        return a.astype(dtype)

    def pad_qkv_w(w):                       # (E, H*E) -> (Ep, H*Ep), per-head padding
        w3 = jnp.asarray(w, jnp.float32).reshape(E, H, E)
        w3 = jnp.pad(w3, ((0, Ep - E), (0, 0), (0, Ep - E)))
        return w3.reshape(Ep, H * Ep).astype(cdt)

    def pad_qkv_b(b):                       # (1, H*E) -> (1, H*Ep), kept in f32
        b3 = jnp.asarray(b, jnp.float32).reshape(1, H, E)
        b3 = jnp.pad(b3, ((0, 0), (0, 0), (0, Ep - E)))
        return b3.reshape(1, H * Ep)

    def pad_wo(w):                          # (H*E, E) -> (H*Ep, Ep)
        w3 = jnp.asarray(w, jnp.float32).reshape(H, E, E)
        w3 = jnp.pad(w3, ((0, 0), (0, Ep - E), (0, Ep - E)))
        return w3.reshape(H * Ep, Ep).astype(cdt)

    wq_p, wk_p, wv_p = pad_qkv_w(params["wq"]), pad_qkv_w(params["wk"]), pad_qkv_w(params["wv"])
    bq_p, bk_p, bv_p = pad_qkv_b(params["bq"]), pad_qkv_b(params["bk"]), pad_qkv_b(params["bv"])
    wo_p = pad_wo(params["wo"])
    bo_p = pad2(params["bo"], 1, Ep, jnp.float32)
    g1_p = pad2(params["g1"], 1, Ep, jnp.float32)
    be1_p = pad2(params["be1"], 1, Ep, jnp.float32)
    w1_p = pad2(params["w1"], Ep, Fp, cdt)
    b1_p = pad2(params["b1"], 1, Fp, jnp.float32)
    w2_p = pad2(params["w2"], Fp, Ep, cdt)
    b2_p = pad2(params["b2"], 1, Ep, jnp.float32)
    g2_p = pad2(params["g2"], 1, Ep, jnp.float32)
    be2_p = pad2(params["be2"], 1, Ep, jnp.float32)

    xp = x if Ep == E else jnp.pad(x, ((0, 0), (0, 0), (0, Ep - E)))

    TQ = _pick_q_tile(S, q_tile)
    n_q = S // TQ

    kernel = functools.partial(
        pat_block_kernel, num_heads=H, e_pad=Ep, e_true=E,
        scale=float(E) ** -0.5, eps=eps, compute_dtype=cdt)

    def inv(shape):                         # grid-invariant 2-D input (DMA'd once)
        return pl.BlockSpec(shape, lambda b, t: (0, 0))

    in_specs = [
        pl.BlockSpec((1, TQ, Ep), lambda b, t: (b, t, 0)),   # x: query rows
        pl.BlockSpec((1, S, Ep), lambda b, t: (b, 0, 0)),    # x: full seq (K/V path)
        inv((Ep, H * Ep)), inv((1, H * Ep)),                 # wq, bq
        inv((Ep, H * Ep)), inv((1, H * Ep)),                 # wk, bk
        inv((Ep, H * Ep)), inv((1, H * Ep)),                 # wv, bv
        inv((H * Ep, Ep)), inv((1, Ep)),                     # wo, bo
        inv((1, Ep)), inv((1, Ep)),                          # ln1 gamma, beta
        inv((Ep, Fp)), inv((1, Fp)),                         # ff1 w, b
        inv((Fp, Ep)), inv((1, Ep)),                         # ff2 w, b
        inv((1, Ep)), inv((1, Ep)),                          # ln2 gamma, beta
    ]

    # VMEM limit derived from the actual chip (v7x: 64 MiB/TC; v5e/v6e: 128 MiB).
    try:
        vmem_cap = int(pltpu.get_tpu_info().vmem_capacity_bytes)
    except Exception:
        vmem_cap = 64 * 1024 * 1024
    vmem_limit = max(32 * 1024 * 1024,
                     min(int(0.8 * vmem_cap), vmem_cap - 20 * 1024 * 1024))

    HEp = H * Ep
    flops = int(B * (3 * 2 * S * Ep * HEp        # q/k/v projections
                     + 2 * 2 * H * S * S * Ep    # scores + context
                     + 2 * S * HEp * Ep          # output projection
                     + 2 * 2 * S * Ep * Fp))     # feed-forward
    transcendentals = int(B * H * S * S)
    param_arrays = (wq_p, bq_p, wk_p, bk_p, wv_p, bv_p, wo_p, bo_p,
                    g1_p, be1_p, w1_p, b1_p, w2_p, b2_p, g2_p, be2_p)
    param_bytes = sum(int(p.size) * p.dtype.itemsize for p in param_arrays)
    # x is read twice (query path + once-per-batch K/V path) and written once.
    bytes_accessed = int(3 * xp.size * xp.dtype.itemsize + param_bytes)

    out = pl.pallas_call(
        kernel,
        out_shape=jax.ShapeDtypeStruct((B, S, Ep), x.dtype),
        grid_spec=pltpu.PrefetchScalarGridSpec(
            num_scalar_prefetch=0,
            grid=(B, n_q),
            in_specs=in_specs,
            out_specs=pl.BlockSpec((1, TQ, Ep), lambda b, t: (b, t, 0)),
            scratch_shapes=[
                pltpu.VMEM((H, Ep, S), cdt),   # cached K, pre-transposed per head
                pltpu.VMEM((H, S, Ep), cdt),   # cached V
            ]),
        compiler_params=pltpu.CompilerParams(
            # Axis 1 (seq tiles) must stay "arbitrary": K/V scratch written at t == 0
            # is reused by later query tiles of the same batch element.
            dimension_semantics=("parallel", "arbitrary"),
            vmem_limit_bytes=vmem_limit),
        cost_estimate=pl.CostEstimate(
            flops=flops, transcendentals=transcendentals,
            bytes_accessed=bytes_accessed),
    )(xp, xp,
      wq_p, bq_p, wk_p, bk_p, wv_p, bv_p,
      wo_p, bo_p, g1_p, be1_p,
      w1_p, b1_p, w2_p, b2_p, g2_p, be2_p)

    return out if Ep == E else out[..., :E]


def pat_block_reference(x, params, *, num_heads, eps=1e-6):
    """Pure-JAX reference matching the PyTorch PATBlock forward (dropout = identity)."""
    B, S, E = x.shape
    H = num_heads
    q = (x @ params["wq"] + params["bq"]).reshape(B, S, H, E).transpose(0, 2, 1, 3)
    k = (x @ params["wk"] + params["bk"]).reshape(B, S, H, E).transpose(0, 2, 1, 3)
    v = (x @ params["wv"] + params["bv"]).reshape(B, S, H, E).transpose(0, 2, 1, 3)
    s = jnp.einsum('bhqe,bhke->bhqk', q, k) * (float(E) ** -0.5)
    p = jax.nn.softmax(s, axis=-1)
    ctx = jnp.einsum('bhqk,bhke->bhqe', p, v).transpose(0, 2, 1, 3).reshape(B, S, H * E)
    attn = ctx @ params["wo"] + params["bo"]

    def ln(v_, g, b):
        mu = v_.mean(-1, keepdims=True)
        var = ((v_ - mu) ** 2).mean(-1, keepdims=True)
        return (v_ - mu) / jnp.sqrt(var + eps) * g + b

    x1 = ln(x + attn, params["g1"], params["be1"])
    h1 = jnp.maximum(x1 @ params["w1"] + params["b1"], 0.0)
    x2 = ln(x1 + h1 @ params["w2"] + params["b2"], params["g2"], params["be2"])
    return x2


def init_params(key, embed_dim, num_heads, ff_dim, dtype=jnp.float32):
    """Deterministic synthetic parameters (PyTorch Linear weights pre-transposed
    so the computation is y = x @ W + b)."""
    HE = num_heads * embed_dim
    keys = jax.random.split(key, 6)

    def lin(k, fan_in, fan_out):
        bound = 1.0 / (fan_in ** 0.5)
        kw, kb = jax.random.split(k)
        w = jax.random.uniform(kw, (fan_in, fan_out), dtype, -bound, bound)
        b = jax.random.uniform(kb, (1, fan_out), dtype, -bound, bound)
        return w, b

    wq, bq = lin(keys[0], embed_dim, HE)
    wk, bk = lin(keys[1], embed_dim, HE)
    wv, bv = lin(keys[2], embed_dim, HE)
    wo, bo = lin(keys[3], HE, embed_dim)
    w1, b1 = lin(keys[4], embed_dim, ff_dim)
    w2, b2 = lin(keys[5], ff_dim, embed_dim)

    return dict(
        wq=wq, bq=bq, wk=wk, bk=bk, wv=wv, bv=bv, wo=wo, bo=bo,
        g1=jnp.ones((1, embed_dim), dtype), be1=jnp.zeros((1, embed_dim), dtype),
        w1=w1, b1=b1, w2=w2, b2=b2,
        g2=jnp.ones((1, embed_dim), dtype), be2=jnp.zeros((1, embed_dim), dtype),
    )


if __name__ == "__main__":
    def run_case(B, S, E, H, FF, q_tile, seed):
        key = jax.random.PRNGKey(seed)
        k_x, k_p = jax.random.split(key)
        x = jax.random.normal(k_x, (B, S, E), dtype=jnp.float32)
        params = init_params(k_p, E, H, FF)

        out = jax.block_until_ready(
            pat_block_forward(x, params, num_heads=H, eps=1e-6, q_tile=q_tile))
        assert out.shape == (B, S, E), out.shape
        assert bool(jnp.all(jnp.isfinite(out)))

        ref = jax.block_until_ready(
            pat_block_reference(x, params, num_heads=H, eps=1e-6))
        err = float(jnp.max(jnp.abs(out - ref)))
        # bf16 matmul operands (f32 accumulation / statistics) -> loose tolerance.
        assert bool(jnp.allclose(out, ref, rtol=5e-2, atol=5e-2)), err

    # Small shapes consistent with the module (batch=2, seq=8, embed=32, heads=2, ff=64).
    run_case(B=2, S=8, E=32, H=2, FF=64, q_tile=256, seed=0)
    # Second case exercises multi-tile (n_q > 1) reuse of the cached K/V scratch.
    run_case(B=1, S=16, E=32, H=2, FF=64, q_tile=8, seed=1)

    print("KERNEL_OK")
</pallas_src>

<mosaic_0001>
module attributes {stable_mosaic.version = 11 : i64} {
  func.func @pat_block_kernel(%arg0: i32, %arg1: i32, %arg2: memref<1x8x128xf32, #tpu.memory_space<vmem>>, %arg3: memref<1x8x128xf32, #tpu.memory_space<vmem>>, %arg4: memref<128x256xbf16, #tpu.memory_space<vmem>>, %arg5: memref<1x256xf32, #tpu.memory_space<vmem>>, %arg6: memref<128x256xbf16, #tpu.memory_space<vmem>>, %arg7: memref<1x256xf32, #tpu.memory_space<vmem>>, %arg8: memref<128x256xbf16, #tpu.memory_space<vmem>>, %arg9: memref<1x256xf32, #tpu.memory_space<vmem>>, %arg10: memref<256x128xbf16, #tpu.memory_space<vmem>>, %arg11: memref<1x128xf32, #tpu.memory_space<vmem>>, %arg12: memref<1x128xf32, #tpu.memory_space<vmem>>, %arg13: memref<1x128xf32, #tpu.memory_space<vmem>>, %arg14: memref<128x128xbf16, #tpu.memory_space<vmem>>, %arg15: memref<1x128xf32, #tpu.memory_space<vmem>>, %arg16: memref<128x128xbf16, #tpu.memory_space<vmem>>, %arg17: memref<1x128xf32, #tpu.memory_space<vmem>>, %arg18: memref<1x128xf32, #tpu.memory_space<vmem>>, %arg19: memref<1x128xf32, #tpu.memory_space<vmem>>, %arg20: memref<1x8x128xf32, #tpu.memory_space<vmem>>, %arg21: memref<2x128x8xbf16, #tpu.memory_space<vmem>>, %arg22: memref<2x8x128xbf16, #tpu.memory_space<vmem>>) attributes {dimension_semantics = [#tpu.dimension_semantics<parallel>, #tpu.dimension_semantics<arbitrary>], iteration_bounds = array<i64: 2, 1>, scalar_prefetch = 0 : i64, scratch_operands = 2 : i64, tpu.core_type = #tpu.core_type<tc>, window_params = [{transform_indices = @transform_0, window_bounds = array<i64: 1, 8, 128>}, {transform_indices = @transform_1, window_bounds = array<i64: 1, 8, 128>}, {pipeline_mode = #tpu.pipeline_mode<synchronous>, transform_indices = @transform_2, window_bounds = array<i64: 128, 256>}, {pipeline_mode = #tpu.pipeline_mode<synchronous>, transform_indices = @transform_3, window_bounds = array<i64: 1, 256>}, {pipeline_mode = #tpu.pipeline_mode<synchronous>, transform_indices = @transform_4, window_bounds = array<i64: 128, 256>}, {pipeline_mode = #tpu.pipeline_mode<synchronous>, transform_indices = @transform_5, window_bounds = array<i64: 1, 256>}, {pipeline_mode = #tpu.pipeline_mode<synchronous>, transform_indices = @transform_6, window_bounds = array<i64: 128, 256>}, {pipeline_mode = #tpu.pipeline_mode<synchronous>, transform_indices = @transform_7, window_bounds = array<i64: 1, 256>}, {pipeline_mode = #tpu.pipeline_mode<synchronous>, transform_indices = @transform_8, window_bounds = array<i64: 256, 128>}, {pipeline_mode = #tpu.pipeline_mode<synchronous>, transform_indices = @transform_9, window_bounds = array<i64: 1, 128>}, {pipeline_mode = #tpu.pipeline_mode<synchronous>, transform_indices = @transform_10, window_bounds = array<i64: 1, 128>}, {pipeline_mode = #tpu.pipeline_mode<synchronous>, transform_indices = @transform_11, window_bounds = array<i64: 1, 128>}, {pipeline_mode = #tpu.pipeline_mode<synchronous>, transform_indices = @transform_12, window_bounds = array<i64: 128, 128>}, {pipeline_mode = #tpu.pipeline_mode<synchronous>, transform_indices = @transform_13, window_bounds = array<i64: 1, 128>}, {pipeline_mode = #tpu.pipeline_mode<synchronous>, transform_indices = @transform_14, window_bounds = array<i64: 128, 128>}, {pipeline_mode = #tpu.pipeline_mode<synchronous>, transform_indices = @transform_15, window_bounds = array<i64: 1, 128>}, {pipeline_mode = #tpu.pipeline_mode<synchronous>, transform_indices = @transform_16, window_bounds = array<i64: 1, 128>}, {pipeline_mode = #tpu.pipeline_mode<synchronous>, transform_indices = @transform_17, window_bounds = array<i64: 1, 128>}, {transform_indices = @transform_18, window_bounds = array<i64: 1, 8, 128>}]} {
    %c0_i32 = arith.constant 0 : i32
    %0 = arith.cmpi eq, %arg1, %c0_i32 : i32
    %1 = arith.extui %0 : i1 to i32
    %c0_i32_0 = arith.constant 0 : i32
    %2 = arith.cmpi ne, %1, %c0_i32_0 : i32
    scf.if %2 {
      %c0_64 = arith.constant 0 : index
      %c0_65 = arith.constant 0 : index
      %c0_66 = arith.constant 0 : index
      %132 = vector.load %arg3[%c0_64, %c0_65, %c0_66] : memref<1x8x128xf32, #tpu.memory_space<vmem>>, vector<1x8x128xf32>
      %133 = vector.shape_cast %132 : vector<1x8x128xf32> to vector<8x128xf32>
      %134 = arith.truncf %133 : vector<8x128xf32> to vector<8x128xbf16>
      %c0_67 = arith.constant 0 : index
      %c0_68 = arith.constant 0 : index
      %135 = vector.load %arg6[%c0_67, %c0_68] : memref<128x256xbf16, #tpu.memory_space<vmem>>, vector<128x256xbf16>
      %cst_69 = arith.constant dense<0.000000e+00> : vector<8x256xf32>
      %136 = tpu.matmul %134, %135, %cst_69 {dimension_numbers = #tpu.dot_dimension_numbers<[1], [0], [0], [1], [0, 0, 1, 1], [], []>} : vector<8x128xbf16>, vector<128x256xbf16>, vector<8x256xf32> -> vector<8x256xf32>
      %c0_70 = arith.constant 0 : index
      %c0_71 = arith.constant 0 : index
      %137 = vector.load %arg7[%c0_70, %c0_71] : memref<1x256xf32, #tpu.memory_space<vmem>>, vector<1x256xf32>
      %138 = vector.broadcast %137 : vector<1x256xf32> to vector<8x256xf32>
      %139 = arith.addf %136, %138 : vector<8x256xf32>
      %c0_72 = arith.constant 0 : index
      %c0_73 = arith.constant 0 : index
      %140 = vector.load %arg8[%c0_72, %c0_73] : memref<128x256xbf16, #tpu.memory_space<vmem>>, vector<128x256xbf16>
      %cst_74 = arith.constant dense<0.000000e+00> : vector<8x256xf32>
      %141 = tpu.matmul %134, %140, %cst_74 {dimension_numbers = #tpu.dot_dimension_numbers<[1], [0], [0], [1], [0, 0, 1, 1], [], []>} : vector<8x128xbf16>, vector<128x256xbf16>, vector<8x256xf32> -> vector<8x256xf32>
      %c0_75 = arith.constant 0 : index
      %c0_76 = arith.constant 0 : index
      %142 = vector.load %arg9[%c0_75, %c0_76] : memref<1x256xf32, #tpu.memory_space<vmem>>, vector<1x256xf32>
      %143 = vector.broadcast %142 : vector<1x256xf32> to vector<8x256xf32>
      %144 = arith.addf %141, %143 : vector<8x256xf32>
      %145 = vector.extract_strided_slice %139 {offsets = [0, 0], sizes = [8, 128], strides = [1, 1]} : vector<8x256xf32> to vector<8x128xf32>
      %146 = tpu.transpose %145, [1, 0] : vector<8x128xf32> -> vector<128x8xf32>
      %147 = arith.truncf %146 : vector<128x8xf32> to vector<128x8xbf16>
      %c0_77 = arith.constant 0 : index
      %c0_78 = arith.constant 0 : index
      %c0_79 = arith.constant 0 : index
      %148 = vector.load %arg21[%c0_77, %c0_78, %c0_79] : memref<2x128x8xbf16, #tpu.memory_space<vmem>>, vector<1x128x8xbf16>
      %149 = vector.shape_cast %148 : vector<1x128x8xbf16> to vector<128x8xbf16>
      %150 = vector.shape_cast %147 : vector<128x8xbf16> to vector<1x128x8xbf16>
      tpu.vector_store %arg21[%c0_77, %c0_78, %c0_79], %150 {strides = array<i32>} : memref<2x128x8xbf16, #tpu.memory_space<vmem>>, vector<1x128x8xbf16>,
      %151 = vector.extract_strided_slice %144 {offsets = [0, 0], sizes = [8, 128], strides = [1, 1]} : vector<8x256xf32> to vector<8x128xf32>
      %152 = arith.truncf %151 : vector<8x128xf32> to vector<8x128xbf16>
      %c0_80 = arith.constant 0 : index
      %c0_81 = arith.constant 0 : index
      %c0_82 = arith.constant 0 : index
      %153 = vector.load %arg22[%c0_80, %c0_81, %c0_82] : memref<2x8x128xbf16, #tpu.memory_space<vmem>>, vector<1x8x128xbf16>
      %154 = vector.shape_cast %153 : vector<1x8x128xbf16> to vector<8x128xbf16>
      %155 = vector.shape_cast %152 : vector<8x128xbf16> to vector<1x8x128xbf16>
      tpu.vector_store %arg22[%c0_80, %c0_81, %c0_82], %155 {strides = array<i32>} : memref<2x8x128xbf16, #tpu.memory_space<vmem>>, vector<1x8x128xbf16>,
      %156 = vector.extract_strided_slice %139 {offsets = [0, 128], sizes = [8, 128], strides = [1, 1]} : vector<8x256xf32> to vector<8x128xf32>
      %157 = tpu.transpose %156, [1, 0] : vector<8x128xf32> -> vector<128x8xf32>
      %158 = arith.truncf %157 : vector<128x8xf32> to vector<128x8xbf16>
      %c1_83 = arith.constant 1 : index
      %c0_84 = arith.constant 0 : index
      %c0_85 = arith.constant 0 : index
      %159 = vector.load %arg21[%c1_83, %c0_84, %c0_85] : memref<2x128x8xbf16, #tpu.memory_space<vmem>>, vector<1x128x8xbf16>
      %160 = vector.shape_cast %159 : vector<1x128x8xbf16> to vector<128x8xbf16>
      %161 = vector.shape_cast %158 : vector<128x8xbf16> to vector<1x128x8xbf16>
      tpu.vector_store %arg21[%c1_83, %c0_84, %c0_85], %161 {strides = array<i32>} : memref<2x128x8xbf16, #tpu.memory_space<vmem>>, vector<1x128x8xbf16>,
      %162 = vector.extract_strided_slice %144 {offsets = [0, 128], sizes = [8, 128], strides = [1, 1]} : vector<8x256xf32> to vector<8x128xf32>
      %163 = arith.truncf %162 : vector<8x128xf32> to vector<8x128xbf16>
      %c1_86 = arith.constant 1 : index
      %c0_87 = arith.constant 0 : index
      %c0_88 = arith.constant 0 : index
      %164 = vector.load %arg22[%c1_86, %c0_87, %c0_88] : memref<2x8x128xbf16, #tpu.memory_space<vmem>>, vector<1x8x128xbf16>
      %165 = vector.shape_cast %164 : vector<1x8x128xbf16> to vector<8x128xbf16>
      %166 = vector.shape_cast %163 : vector<8x128xbf16> to vector<1x8x128xbf16>
      tpu.vector_store %arg22[%c1_86, %c0_87, %c0_88], %166 {strides = array<i32>} : memref<2x8x128xbf16, #tpu.memory_space<vmem>>, vector<1x8x128xbf16>,
    } else {
    }
    %c0 = arith.constant 0 : index
    %c0_1 = arith.constant 0 : index
    %c0_2 = arith.constant 0 : index
    %3 = vector.load %arg2[%c0, %c0_1, %c0_2] : memref<1x8x128xf32, #tpu.memory_space<vmem>>, vector<1x8x128xf32>
    %4 = vector.shape_cast %3 : vector<1x8x128xf32> to vector<8x128xf32>
    %5 = arith.truncf %4 : vector<8x128xf32> to vector<8x128xbf16>
    %c0_3 = arith.constant 0 : index
    %c0_4 = arith.constant 0 : index
    %6 = vector.load %arg4[%c0_3, %c0_4] : memref<128x256xbf16, #tpu.memory_space<vmem>>, vector<128x256xbf16>
    %cst = arith.constant dense<0.000000e+00> : vector<8x256xf32>
    %7 = tpu.matmul %5, %6, %cst {dimension_numbers = #tpu.dot_dimension_numbers<[1], [0], [0], [1], [0, 0, 1, 1], [], []>} : vector<8x128xbf16>, vector<128x256xbf16>, vector<8x256xf32> -> vector<8x256xf32>
    %c0_5 = arith.constant 0 : index
    %c0_6 = arith.constant 0 : index
    %8 = vector.load %arg5[%c0_5, %c0_6] : memref<1x256xf32, #tpu.memory_space<vmem>>, vector<1x256xf32>
    %9 = vector.broadcast %8 : vector<1x256xf32> to vector<8x256xf32>
    %10 = arith.addf %7, %9 : vector<8x256xf32>
    %cst_7 = arith.constant 0.176776692 : f32
    %11 = vector.broadcast %cst_7 : f32 to vector<8x256xf32>
    %12 = arith.mulf %10, %11 : vector<8x256xf32>
    %13 = arith.truncf %12 : vector<8x256xf32> to vector<8x256xbf16>
    %14 = vector.extract_strided_slice %13 {offsets = [0, 0], sizes = [8, 128], strides = [1, 1]} : vector<8x256xbf16> to vector<8x128xbf16>
    %c0_8 = arith.constant 0 : index
    %c0_9 = arith.constant 0 : index
    %c0_10 = arith.constant 0 : index
    %15 = vector.load %arg21[%c0_8, %c0_9, %c0_10] : memref<2x128x8xbf16, #tpu.memory_space<vmem>>, vector<1x128x8xbf16>
    %16 = vector.shape_cast %15 : vector<1x128x8xbf16> to vector<128x8xbf16>
    %cst_11 = arith.constant dense<0.000000e+00> : vector<8x8xf32>
    %17 = tpu.matmul %14, %16, %cst_11 {dimension_numbers = #tpu.dot_dimension_numbers<[1], [0], [0], [1], [0, 0, 1, 1], [], []>} : vector<8x128xbf16>, vector<128x8xbf16>, vector<8x8xf32> -> vector<8x8xf32>
    %cst_12 = arith.constant dense<0xFF800000> : vector<8xf32>
    %18 = vector.multi_reduction <maximumf>, %17, %cst_12 [1] : vector<8x8xf32> to vector<8xf32>
    %19 = vector.shape_cast %18 : vector<8xf32> to vector<8x1xf32>
    %20 = vector.broadcast %19 : vector<8x1xf32> to vector<8x8xf32>
    %21 = arith.subf %17, %20 : vector<8x8xf32>
    %22 = math.exp %21 : vector<8x8xf32>
    %cst_13 = arith.constant dense<0.000000e+00> : vector<8xf32>
    %23 = vector.multi_reduction <add>, %22, %cst_13 [1] : vector<8x8xf32> to vector<8xf32>
    %24 = vector.shape_cast %23 : vector<8xf32> to vector<8x1xf32>
    %25 = vector.broadcast %24 : vector<8x1xf32> to vector<8x8xf32>
    %26 = arith.divf %22, %25 : vector<8x8xf32>
    %27 = arith.truncf %26 : vector<8x8xf32> to vector<8x8xbf16>
    %c0_14 = arith.constant 0 : index
    %c0_15 = arith.constant 0 : index
    %c0_16 = arith.constant 0 : index
    %28 = vector.load %arg22[%c0_14, %c0_15, %c0_16] : memref<2x8x128xbf16, #tpu.memory_space<vmem>>, vector<1x8x128xbf16>
    %29 = vector.shape_cast %28 : vector<1x8x128xbf16> to vector<8x128xbf16>
    %cst_17 = arith.constant dense<0.000000e+00> : vector<8x128xf32>
    %30 = tpu.matmul %27, %29, %cst_17 {dimension_numbers = #tpu.dot_dimension_numbers<[1], [0], [0], [1], [0, 0, 1, 1], [], []>} : vector<8x8xbf16>, vector<8x128xbf16>, vector<8x128xf32> -> vector<8x128xf32>
    %31 = arith.truncf %30 : vector<8x128xf32> to vector<8x128xbf16>
    %32 = vector.extract_strided_slice %13 {offsets = [0, 128], sizes = [8, 128], strides = [1, 1]} : vector<8x256xbf16> to vector<8x128xbf16>
    %c1 = arith.constant 1 : index
    %c0_18 = arith.constant 0 : index
    %c0_19 = arith.constant 0 : index
    %33 = vector.load %arg21[%c1, %c0_18, %c0_19] : memref<2x128x8xbf16, #tpu.memory_space<vmem>>, vector<1x128x8xbf16>
    %34 = vector.shape_cast %33 : vector<1x128x8xbf16> to vector<128x8xbf16>
    %cst_20 = arith.constant dense<0.000000e+00> : vector<8x8xf32>
    %35 = tpu.matmul %32, %34, %cst_20 {dimension_numbers = #tpu.dot_dimension_numbers<[1], [0], [0], [1], [0, 0, 1, 1], [], []>} : vector<8x128xbf16>, vector<128x8xbf16>, vector<8x8xf32> -> vector<8x8xf32>
    %cst_21 = arith.constant dense<0xFF800000> : vector<8xf32>
    %36 = vector.multi_reduction <maximumf>, %35, %cst_21 [1] : vector<8x8xf32> to vector<8xf32>
    %37 = vector.shape_cast %36 : vector<8xf32> to vector<8x1xf32>
    %38 = vector.broadcast %37 : vector<8x1xf32> to vector<8x8xf32>
    %39 = arith.subf %35, %38 : vector<8x8xf32>
    %40 = math.exp %39 : vector<8x8xf32>
    %cst_22 = arith.constant dense<0.000000e+00> : vector<8xf32>
    %41 = vector.multi_reduction <add>, %40, %cst_22 [1] : vector<8x8xf32> to vector<8xf32>
    %42 = vector.shape_cast %41 : vector<8xf32> to vector<8x1xf32>
    %43 = vector.broadcast %42 : vector<8x1xf32> to vector<8x8xf32>
    %44 = arith.divf %40, %43 : vector<8x8xf32>
    %45 = arith.truncf %44 : vector<8x8xf32> to vector<8x8xbf16>
    %c1_23 = arith.constant 1 : index
    %c0_24 = arith.constant 0 : index
    %c0_25 = arith.constant 0 : index
    %46 = vector.load %arg22[%c1_23, %c0_24, %c0_25] : memref<2x8x128xbf16, #tpu.memory_space<vmem>>, vector<1x8x128xbf16>
    %47 = vector.shape_cast %46 : vector<1x8x128xbf16> to vector<8x128xbf16>
    %cst_26 = arith.constant dense<0.000000e+00> : vector<8x128xf32>
    %48 = tpu.matmul %45, %47, %cst_26 {dimension_numbers = #tpu.dot_dimension_numbers<[1], [0], [0], [1], [0, 0, 1, 1], [], []>} : vector<8x8xbf16>, vector<8x128xbf16>, vector<8x128xf32> -> vector<8x128xf32>
    %49 = arith.truncf %48 : vector<8x128xf32> to vector<8x128xbf16>
    %50 = tpu.concatenate %31, %49 in 1 : vector<8x128xbf16>, vector<8x128xbf16> -> vector<8x256xbf16>
    %c0_27 = arith.constant 0 : index
    %c0_28 = arith.constant 0 : index
    %51 = vector.load %arg10[%c0_27, %c0_28] : memref<256x128xbf16, #tpu.memory_space<vmem>>, vector<256x128xbf16>
    %cst_29 = arith.constant dense<0.000000e+00> : vector<8x128xf32>
    %52 = tpu.matmul %50, %51, %cst_29 {dimension_numbers = #tpu.dot_dimension_numbers<[1], [0], [0], [1], [0, 0, 1, 1], [], []>} : vector<8x256xbf16>, vector<256x128xbf16>, vector<8x128xf32> -> vector<8x128xf32>
    %c0_30 = arith.constant 0 : index
    %c0_31 = arith.constant 0 : index
    %53 = vector.load %arg11[%c0_30, %c0_31] : memref<1x128xf32, #tpu.memory_space<vmem>>, vector<1x128xf32>
    %54 = vector.broadcast %53 : vector<1x128xf32> to vector<8x128xf32>
    %55 = arith.addf %52, %54 : vector<8x128xf32>
    %56 = tpu.iota {dimensions = array<i32: 1>} : vector<1x128xi32>
    %c32_i32 = arith.constant 32 : i32
    %57 = vector.broadcast %c32_i32 : i32 to vector<1x128xi32>
    %58 = arith.cmpi slt, %56, %57 : vector<1x128xi32>
    %59 = arith.extui %58 : vector<1x128xi1> to vector<1x128xi32>
    %60 = arith.sitofp %59 : vector<1x128xi32> to vector<1x128xf32>
    %61 = arith.addf %4, %55 : vector<8x128xf32>
    %c0_32 = arith.constant 0 : index
    %c0_33 = arith.constant 0 : index
    %62 = vector.load %arg12[%c0_32, %c0_33] : memref<1x128xf32, #tpu.memory_space<vmem>>, vector<1x128xf32>
    %c0_34 = arith.constant 0 : index
    %c0_35 = arith.constant 0 : index
    %63 = vector.load %arg13[%c0_34, %c0_35] : memref<1x128xf32, #tpu.memory_space<vmem>>, vector<1x128xf32>
    %64 = vector.broadcast %60 : vector<1x128xf32> to vector<8x128xf32>
    %65 = arith.mulf %61, %64 : vector<8x128xf32>
    %cst_36 = arith.constant dense<0.000000e+00> : vector<8xf32>
    %66 = vector.multi_reduction <add>, %65, %cst_36 [1] : vector<8x128xf32> to vector<8xf32>
    %67 = vector.shape_cast %66 : vector<8xf32> to vector<8x1xf32>
    %cst_37 = arith.constant 3.125000e-02 : f32
    %68 = vector.broadcast %cst_37 : f32 to vector<8x1xf32>
    %69 = arith.mulf %67, %68 : vector<8x1xf32>
    %70 = vector.broadcast %69 : vector<8x1xf32> to vector<8x128xf32>
    %71 = arith.subf %65, %70 : vector<8x128xf32>
    %72 = vector.broadcast %60 : vector<1x128xf32> to vector<8x128xf32>
    %73 = arith.mulf %71, %72 : vector<8x128xf32>
    %74 = arith.mulf %73, %73 : vector<8x128xf32>
    %cst_38 = arith.constant dense<0.000000e+00> : vector<8xf32>
    %75 = vector.multi_reduction <add>, %74, %cst_38 [1] : vector<8x128xf32> to vector<8xf32>
    %76 = vector.shape_cast %75 : vector<8xf32> to vector<8x1xf32>
    %cst_39 = arith.constant 3.125000e-02 : f32
    %77 = vector.broadcast %cst_39 : f32 to vector<8x1xf32>
    %78 = arith.mulf %76, %77 : vector<8x1xf32>
    %cst_40 = arith.constant 9.99999997E-7 : f32
    %79 = vector.broadcast %cst_40 : f32 to vector<8x1xf32>
    %80 = arith.addf %78, %79 : vector<8x1xf32>
    %81 = math.rsqrt %80 : vector<8x1xf32>
    %82 = vector.broadcast %81 : vector<8x1xf32> to vector<8x128xf32>
    %83 = arith.mulf %73, %82 : vector<8x128xf32>
    %84 = vector.broadcast %62 : vector<1x128xf32> to vector<8x128xf32>
    %85 = arith.mulf %83, %84 : vector<8x128xf32>
    %86 = vector.broadcast %63 : vector<1x128xf32> to vector<8x128xf32>
    %87 = arith.addf %85, %86 : vector<8x128xf32>
    %88 = arith.truncf %87 : vector<8x128xf32> to vector<8x128xbf16>
    %c0_41 = arith.constant 0 : index
    %c0_42 = arith.constant 0 : index
    %89 = vector.load %arg14[%c0_41, %c0_42] : memref<128x128xbf16, #tpu.memory_space<vmem>>, vector<128x128xbf16>
    %cst_43 = arith.constant dense<0.000000e+00> : vector<8x128xf32>
    %90 = tpu.matmul %88, %89, %cst_43 {dimension_numbers = #tpu.dot_dimension_numbers<[1], [0], [0], [1], [0, 0, 1, 1], [], []>} : vector<8x128xbf16>, vector<128x128xbf16>, vector<8x128xf32> -> vector<8x128xf32>
    %c0_44 = arith.constant 0 : index
    %c0_45 = arith.constant 0 : index
    %91 = vector.load %arg15[%c0_44, %c0_45] : memref<1x128xf32, #tpu.memory_space<vmem>>, vector<1x128xf32>
    %92 = vector.broadcast %91 : vector<1x128xf32> to vector<8x128xf32>
    %93 = arith.addf %90, %92 : vector<8x128xf32>
    %cst_46 = arith.constant 0.000000e+00 : f32
    %94 = vector.broadcast %cst_46 : f32 to vector<8x128xf32>
    %95 = arith.maximumf %93, %94 : vector<8x128xf32>
    %96 = arith.truncf %95 : vector<8x128xf32> to vector<8x128xbf16>
    %c0_47 = arith.constant 0 : index
    %c0_48 = arith.constant 0 : index
    %97 = vector.load %arg16[%c0_47, %c0_48] : memref<128x128xbf16, #tpu.memory_space<vmem>>, vector<128x128xbf16>
    %cst_49 = arith.constant dense<0.000000e+00> : vector<8x128xf32>
    %98 = tpu.matmul %96, %97, %cst_49 {dimension_numbers = #tpu.dot_dimension_numbers<[1], [0], [0], [1], [0, 0, 1, 1], [], []>} : vector<8x128xbf16>, vector<128x128xbf16>, vector<8x128xf32> -> vector<8x128xf32>
    %c0_50 = arith.constant 0 : index
    %c0_51 = arith.constant 0 : index
    %99 = vector.load %arg17[%c0_50, %c0_51] : memref<1x128xf32, #tpu.memory_space<vmem>>, vector<1x128xf32>
    %100 = vector.broadcast %99 : vector<1x128xf32> to vector<8x128xf32>
    %101 = arith.addf %98, %100 : vector<8x128xf32>
    %102 = arith.addf %87, %101 : vector<8x128xf32>
    %c0_52 = arith.constant 0 : index
    %c0_53 = arith.constant 0 : index
    %103 = vector.load %arg18[%c0_52, %c0_53] : memref<1x128xf32, #tpu.memory_space<vmem>>, vector<1x128xf32>
    %c0_54 = arith.constant 0 : index
    %c0_55 = arith.constant 0 : index
    %104 = vector.load %arg19[%c0_54, %c0_55] : memref<1x128xf32, #tpu.memory_space<vmem>>, vector<1x128xf32>
    %105 = vector.broadcast %60 : vector<1x128xf32> to vector<8x128xf32>
    %106 = arith.mulf %102, %105 : vector<8x128xf32>
    %cst_56 = arith.constant dense<0.000000e+00> : vector<8xf32>
    %107 = vector.multi_reduction <add>, %106, %cst_56 [1] : vector<8x128xf32> to vector<8xf32>
    %108 = vector.shape_cast %107 : vector<8xf32> to vector<8x1xf32>
    %cst_57 = arith.constant 3.125000e-02 : f32
    %109 = vector.broadcast %cst_57 : f32 to vector<8x1xf32>
    %110 = arith.mulf %108, %109 : vector<8x1xf32>
    %111 = vector.broadcast %110 : vector<8x1xf32> to vector<8x128xf32>
    %112 = arith.subf %106, %111 : vector<8x128xf32>
    %113 = vector.broadcast %60 : vector<1x128xf32> to vector<8x128xf32>
    %114 = arith.mulf %112, %113 : vector<8x128xf32>
    %115 = arith.mulf %114, %114 : vector<8x128xf32>
    %cst_58 = arith.constant dense<0.000000e+00> : vector<8xf32>
    %116 = vector.multi_reduction <add>, %115, %cst_58 [1] : vector<8x128xf32> to vector<8xf32>
    %117 = vector.shape_cast %116 : vector<8xf32> to vector<8x1xf32>
    %cst_59 = arith.constant 3.125000e-02 : f32
    %118 = vector.broadcast %cst_59 : f32 to vector<8x1xf32>
    %119 = arith.mulf %117, %118 : vector<8x1xf32>
    %cst_60 = arith.constant 9.99999997E-7 : f32
    %120 = vector.broadcast %cst_60 : f32 to vector<8x1xf32>
    %121 = arith.addf %119, %120 : vector<8x1xf32>
    %122 = math.rsqrt %121 : vector<8x1xf32>
    %123 = vector.broadcast %122 : vector<8x1xf32> to vector<8x128xf32>
    %124 = arith.mulf %114, %123 : vector<8x128xf32>
    %125 = vector.broadcast %103 : vector<1x128xf32> to vector<8x128xf32>
    %126 = arith.mulf %124, %125 : vector<8x128xf32>
    %127 = vector.broadcast %104 : vector<1x128xf32> to vector<8x128xf32>
    %128 = arith.addf %126, %127 : vector<8x128xf32>
    %c0_61 = arith.constant 0 : index
    %c0_62 = arith.constant 0 : index
    %c0_63 = arith.constant 0 : index
    %129 = vector.load %arg20[%c0_61, %c0_62, %c0_63] : memref<1x8x128xf32, #tpu.memory_space<vmem>>, vector<1x8x128xf32>
    %130 = vector.shape_cast %129 : vector<1x8x128xf32> to vector<8x128xf32>
    %131 = vector.shape_cast %128 : vector<8x128xf32> to vector<1x8x128xf32>
    tpu.vector_store %arg20[%c0_61, %c0_62, %c0_63], %131 {strides = array<i32>} : memref<1x8x128xf32, #tpu.memory_space<vmem>>, vector<1x8x128xf32>,
    return
  }
  func.func @transform_0(%arg0: i32, %arg1: i32) -> (i32, i32, i32) {
    %c0_i32 = arith.constant 0 : i32
    %c0_i32_0 = arith.constant 0 : i32
    return %arg0, %arg1, %c0_i32 : i32, i32, i32
  }
  func.func @transform_1(%arg0: i32, %arg1: i32) -> (i32, i32, i32) {
    %c0_i32 = arith.constant 0 : i32
    %c0_i32_0 = arith.constant 0 : i32
    %c0_i32_1 = arith.constant 0 : i32
    return %arg0, %c0_i32, %c0_i32_0 : i32, i32, i32
  }
  func.func @transform_2(%arg0: i32, %arg1: i32) -> (i32, i32) {
    %c0_i32 = arith.constant 0 : i32
    %c0_i32_0 = arith.constant 0 : i32
    %c0_i32_1 = arith.constant 0 : i32
    return %c0_i32, %c0_i32_0 : i32, i32
  }
  func.func @transform_3(%arg0: i32, %arg1: i32) -> (i32, i32) {
    %c0_i32 = arith.constant 0 : i32
    %c0_i32_0 = arith.constant 0 : i32
    %c0_i32_1 = arith.constant 0 : i32
    return %c0_i32, %c0_i32_0 : i32, i32
  }
  func.func @transform_4(%arg0: i32, %arg1: i32) -> (i32, i32) {
    %c0_i32 = arith.constant 0 : i32
    %c0_i32_0 = arith.constant 0 : i32
    %c0_i32_1 = arith.constant 0 : i32
    return %c0_i32, %c0_i32_0 : i32, i32
  }
  func.func @transform_5(%arg0: i32, %arg1: i32) -> (i32, i32) {
    %c0_i32 = arith.constant 0 : i32
    %c0_i32_0 = arith.constant 0 : i32
    %c0_i32_1 = arith.constant 0 : i32
    return %c0_i32, %c0_i32_0 : i32, i32
  }
  func.func @transform_6(%arg0: i32, %arg1: i32) -> (i32, i32) {
    %c0_i32 = arith.constant 0 : i32
    %c0_i32_0 = arith.constant 0 : i32
    %c0_i32_1 = arith.constant 0 : i32
    return %c0_i32, %c0_i32_0 : i32, i32
  }
  func.func @transform_7(%arg0: i32, %arg1: i32) -> (i32, i32) {
    %c0_i32 = arith.constant 0 : i32
    %c0_i32_0 = arith.constant 0 : i32
    %c0_i32_1 = arith.constant 0 : i32
    return %c0_i32, %c0_i32_0 : i32, i32
  }
  func.func @transform_8(%arg0: i32, %arg1: i32) -> (i32, i32) {
    %c0_i32 = arith.constant 0 : i32
    %c0_i32_0 = arith.constant 0 : i32
    %c0_i32_1 = arith.constant 0 : i32
    return %c0_i32, %c0_i32_0 : i32, i32
  }
  func.func @transform_9(%arg0: i32, %arg1: i32) -> (i32, i32) {
    %c0_i32 = arith.constant 0 : i32
    %c0_i32_0 = arith.constant 0 : i32
    %c0_i32_1 = arith.constant 0 : i32
    return %c0_i32, %c0_i32_0 : i32, i32
  }
  func.func @transform_10(%arg0: i32, %arg1: i32) -> (i32, i32) {
    %c0_i32 = arith.constant 0 : i32
    %c0_i32_0 = arith.constant 0 : i32
    %c0_i32_1 = arith.constant 0 : i32
    return %c0_i32, %c0_i32_0 : i32, i32
  }
  func.func @transform_11(%arg0: i32, %arg1: i32) -> (i32, i32) {
    %c0_i32 = arith.constant 0 : i32
    %c0_i32_0 = arith.constant 0 : i32
    %c0_i32_1 = arith.constant 0 : i32
    return %c0_i32, %c0_i32_0 : i32, i32
  }
  func.func @transform_12(%arg0: i32, %arg1: i32) -> (i32, i32) {
    %c0_i32 = arith.constant 0 : i32
    %c0_i32_0 = arith.constant 0 : i32
    %c0_i32_1 = arith.constant 0 : i32
    return %c0_i32, %c0_i32_0 : i32, i32
  }
  func.func @transform_13(%arg0: i32, %arg1: i32) -> (i32, i32) {
    %c0_i32 = arith.constant 0 : i32
    %c0_i32_0 = arith.constant 0 : i32
    %c0_i32_1 = arith.constant 0 : i32
    return %c0_i32, %c0_i32_0 : i32, i32
  }
  func.func @transform_14(%arg0: i32, %arg1: i32) -> (i32, i32) {
    %c0_i32 = arith.constant 0 : i32
    %c0_i32_0 = arith.constant 0 : i32
    %c0_i32_1 = arith.constant 0 : i32
    return %c0_i32, %c0_i32_0 : i32, i32
  }
  func.func @transform_15(%arg0: i32, %arg1: i32) -> (i32, i32) {
    %c0_i32 = arith.constant 0 : i32
    %c0_i32_0 = arith.constant 0 : i32
    %c0_i32_1 = arith.constant 0 : i32
    return %c0_i32, %c0_i32_0 : i32, i32
  }
  func.func @transform_16(%arg0: i32, %arg1: i32) -> (i32, i32) {
    %c0_i32 = arith.constant 0 : i32
    %c0_i32_0 = arith.constant 0 : i32
    %c0_i32_1 = arith.constant 0 : i32
    return %c0_i32, %c0_i32_0 : i32, i32
  }
  func.func @transform_17(%arg0: i32, %arg1: i32) -> (i32, i32) {
    %c0_i32 = arith.constant 0 : i32
    %c0_i32_0 = arith.constant 0 : i32
    %c0_i32_1 = arith.constant 0 : i32
    return %c0_i32, %c0_i32_0 : i32, i32
  }
  func.func @transform_18(%arg0: i32, %arg1: i32) -> (i32, i32, i32) {
    %c0_i32 = arith.constant 0 : i32
    %c0_i32_0 = arith.constant 0 : i32
    return %arg0, %arg1, %c0_i32 : i32, i32, i32
  }
}

</mosaic_0001>

<bundles_post_ra>
// kernel: tpu_custom_call.1
= control target key start
LH: loop header
LB: loop body
LE: loop exit
PB: predicated region body
PF: predicated region fallthrough
CT: control target
= control target key end

     0   :  { %s3856_s0 = inlined_call_operand.hbm [shape: f32[2,8,128], index: 0, kind: input, shape index: {}]   ;;  %s3857_s1 = inlined_call_operand.hbm [shape: f32[2,8,128], index: 1, kind: input, shape index: {}]   ;;  %s3858_s2 = inlined_call_operand.hbm [shape: bf16[128,256], index: 2, kind: input, shape index: {}]   ;;  %s3859_s3 = inlined_call_operand.vmem [shape: f32[1,256], index: 3, kind: input, shape index: {}]   ;;  %s3860_s4 = inlined_call_operand.hbm [shape: bf16[128,256], index: 4, kind: input, shape index: {}]   ;;  %s3861_s5 = inlined_call_operand.vmem [shape: f32[1,256], index: 5, kind: input, shape index: {}]   ;;  %s3862_s6 = inlined_call_operand.hbm [shape: bf16[128,256], index: 6, kind: input, shape index: {}]   ;;  %s3863_s7 = inlined_call_operand.vmem [shape: f32[1,256], index: 7, kind: input, shape index: {}]   ;;  %s3864_s8 = inlined_call_operand.hbm [shape: bf16[256,128], index: 8, kind: input, shape index: {}]   ;;  %s3865_s9 = inlined_call_operand.vmem [shape: f32[1,128], index: 9, kind: input, shape index: {}]   ;;  %s3866_s10 = inlined_call_operand.vmem [shape: f32[1,128], index: 10, kind: input, shape index: {}]   ;;  %s3867_s11 = inlined_call_operand.vmem [shape: f32[1,128], index: 11, kind: input, shape index: {}]   ;;  %s3868_s12 = inlined_call_operand.hbm [shape: bf16[128,128], index: 12, kind: input, shape index: {}]   ;;  %s3869_s13 = inlined_call_operand.vmem [shape: f32[1,128], index: 13, kind: input, shape index: {}]   ;;  %s3870_s14 = inlined_call_operand.hbm [shape: bf16[128,128], index: 14, kind: input, shape index: {}]   ;;  %s3871_s15 = inlined_call_operand.vmem [shape: f32[1,128], index: 15, kind: input, shape index: {}]   ;;  %s3872_s16 = inlined_call_operand.vmem [shape: f32[1,128], index: 16, kind: input, shape index: {}]   ;;  %s3873_s17 = inlined_call_operand.vmem [shape: f32[1,128], index: 17, kind: input, shape index: {}]   ;;  %s3874_s18 = inlined_call_operand.hbm [shape: f32[2,8,128], index: 18, kind: output, shape index: {}]  }
   0x1   :  { %3880 = sst [smem:[#allocation30_spill]] %s3856_s0 }
   0x2   :  { %3881 = sst [smem:[#allocation31_spill]] %s3857_s1 }
   0x3   :  { %3882 = sst [smem:[#allocation32_spill]] %s3858_s2 }
   0x4   :  { %3883 = sst [smem:[#allocation33_spill]] %s3860_s4 }
   0x5   :  { %3884 = sst [smem:[#allocation34_spill]] %s3862_s6 }
   0x6   :  { %3885 = sst [smem:[#allocation35_spill]] %s3864_s8 }
   0x7   :  { %3886 = sst [smem:[#allocation36_spill]] %s3868_s12 }
   0x8   :  { %3887 = sst [smem:[#allocation37_spill]] %s3869_s13 }
   0x9   :  { %3888 = sst [smem:[#allocation38_spill]] %s3870_s14 }
   0xa   :  { %3889 = sst [smem:[#allocation39_spill]] %s3871_s15 }
   0xb   :  { %3890 = sst [smem:[#allocation40_spill]] %s3872_s16 }
   0xc   :  { %3891 = sst [smem:[#allocation41_spill]] %s3873_s17 }
   0xd   :  { %3892 = sst [smem:[#allocation42_spill]] %s3874_s18 }
   0xe   :  { %23 = vsyncpa [#allocation5], 0 }
   0xf   :  { %25 = vsyncpa [#allocation5 + $0x1], 0 }
  0x10   :  { %26 = vsyncpa [#allocation8], 0 }
  0x11   :  { %28 = vsyncpa [#allocation8 + $0x1], 0 }
  0x12   :  { %29 = vsyncpa [#allocation11], 0 }
  0x13   :  { %30 = vsyncpa [#allocation14], 0 }
  0x14   :  { %31 = vsyncpa [#allocation17], 0 }
  0x15   :  { %32 = vsyncpa [#allocation6], 0 }
  0x16   :  { %34 = vsyncpa [#allocation6 + $0x1], 0  ;;  %s3440_s27 = smov 0   ;;  %s3442_s28 = smov 0  }
  0x17   :  { %s3444_s29 = smov 0   ;;  %s3446_s30 = smov 0  }
  0x18   :  { %s3448_s0 = smov 0   ;;  %s3450_s19 = smov 0  }
  0x19 LB: > { %3893 = sst [smem:[#allocation26_spill]] %s3319_s30  ;;  %s3471_s1 = sadd.s32 4294967295, %s3327_s19   ;;  %s3327_s19 = sphi %s3450_s19, %s40_s19   ;;  %s3323_s0 = sphi %s3448_s0, %s3931_s0   ;;  %s3319_s30 = sphi %s3446_s30, %s3935_s30   ;;  %s3315_s29 = sphi %s3444_s29, %s3934_s29   ;;  %s3311_s28 = sphi %s3442_s28, %s3933_s28   ;;  %s3307_s27 = sphi %s3440_s27, %s3932_s27  }
  0x1a   : > { %3894 = sst [smem:[#allocation27_spill]] %s3323_s0  ;;  %p2398_p0 = scmp.ge.s32.totalorder %s3327_s19, 1 }
  0x1b   : > { %p3879_p1 = scmp.eq.s32.totalorder %s3471_s1, 0  ;;  %p475_p2 = scmp.lt.s32.totalorder %s3327_s19, 3 }
  0x1c   : > { %s3329_s21 = smov [#allocation9]   ;;  %s3330_s23 = smov [#allocation10]  }
  0x1d   : > { %p3476_p3 = pnand %p2398_p0, %p475_p2  ;;  %s487_s22 = sshll.u32 %s3329_s21, 4  ;;  %s488_s22 = int_to_ptr.vmem [resolvable:$true] %s487_s22 }
  0x1e   : > { %s503_s24 = sshll.u32 %s3330_s23, 4  ;;  %s3331_s25 = smov [#allocation13]   ;;  %s504_s24 = int_to_ptr.vmem [resolvable:$true] %s503_s24 }
  0x1f   : > { %p2778_p4 = pneg %p3476_p3  ;;  %s535_s26 = sshll.u32 %s3331_s25, 4  ;;  %s536_s26 = int_to_ptr.vmem [resolvable:$true] %s535_s26 }
  0x20   : > { %s3026_s21 = scalar_lea.vmem %s488_s22, 2048  ;;  %p3034_p11 = scmp.lt.s32.totalorder %s488_s22, %s488_s22 }
  0x21   : > { %p3485_p6 = pnand %p2778_p4, %p3879_p1  ;;  %p3027_p8 = scmp.ne.s32.totalorder %s488_s22, %s3026_s21 }
  0x22   : > { %p3035_p12 = scmp.lt.s32.totalorder %s3026_s21, %s3026_s21 }
  0x23   : > { %p3491_p7 = pneg %p3485_p6 }
  0x24   : > { %p3036_p13 = por %p3035_p12, %p3034_p11 }
  0x25   : > { %p3029_p9 = pnand %p3027_p8, %p3491_p7 }
  0x27   : > { %p3030_p10 = pneg %p3029_p9 }
  0x29   : > { %p3037_p0 = pnand %p3036_p13, %p3030_p10 }
  0x2b   : > { %3040 = shalt.err (!%p3037_p0)
}
  0x2c   : > { %s3876_s23 = smov 128   ;;  %s3333_s25 = smov 8  }
  0x2d   : > { %s3898_s30 = sld [smem:[#allocation32_spill]]  ;;  %s3052_s15 = scalar_lea.vmem %s504_s24, 2048 }
  0x2e   : > { %p3053_p2 = scmp.ne.s32.totalorder %s504_s24, %s3052_s15  ;;  %p3060_p9 = scmp.lt.s32.totalorder %s504_s24, %s504_s24 }
  0x2f   : > { %p3061_p10 = scmp.lt.s32.totalorder %s3052_s15, %s3052_s15 }
  0x30   : > { %p3055_p4 = pnand %p3053_p2, %p3491_p7 }
  0x31   : > { %p3062_p11 = por %p3061_p10, %p3060_p9 }
  0x32   : > { %p3056_p8 = pneg %p3055_p4 }
  0x33   : > { %2781 = dma.hbm_to_vmem [thread:$0]  (!%p3485_p6), %s3898_s30, 2048, %s488_s22, [#allocation8], %s3876_s23, %s3876_s23, %s3333_s25  }
  0x34   : > { %p3063_p12 = pnand %p3062_p11, %p3056_p8 }
  0x36   : > { %3066 = shalt.err (!%p3063_p12)
}
  0x37   : > { %s3899_s4 = sld [smem:[#allocation33_spill]]  ;;  %s3078_s16 = scalar_lea.vmem %s536_s26, 2048 }
  0x38   : > { %p3079_p13 = scmp.ne.s32.totalorder %s536_s26, %s3078_s16  ;;  %p3086_p4 = scmp.lt.s32.totalorder %s536_s26, %s536_s26 }
  0x39   : > { %p3087_p9 = scmp.lt.s32.totalorder %s3078_s16, %s3078_s16 }
  0x3a   : > { %p3081_p0 = pnand %p3079_p13, %p3491_p7 }
  0x3b   : > { %p3088_p8 = por %p3087_p9, %p3086_p4 }
  0x3c   : > { %p3082_p2 = pneg %p3081_p0 }
  0x3d   : > { %2784 = dma.hbm_to_vmem [thread:$0]  (!%p3485_p6), %s3899_s4, 2048, %s504_s24, [#allocation11], %s3876_s23, %s3876_s23, %s3333_s25  }
  0x3e   : > { %p3089_p10 = pnand %p3088_p8, %p3082_p2 }
  0x40   : > { %3092 = shalt.err (!%p3089_p10)
}
  0x41   : > { %s3334_s15 = smov 64   ;;  %s3335_s17 = smov 4  }
  0x42   : > { %s3900_s8 = sld [smem:[#allocation35_spill]]  ;;  %s3336_s22 = smov [#allocation12]  }
  0x43   : > { %s519_s24 = sshll.u32 %s3336_s22, 4  ;;  %s3337_s21 = smov [#allocation15]   ;;  %s520_s24 = int_to_ptr.vmem [resolvable:$true] %s519_s24 }
  0x44   : > { %s557_s16 = sshll.u32 %s3337_s21, 4  ;;  %s3104_s23 = scalar_lea.vmem %s520_s24, 2048  ;;  %s558_s16 = int_to_ptr.vmem [resolvable:$true] %s557_s16 }
  0x45   : > { %p3105_p11 = scmp.ne.s32.totalorder %s520_s24, %s3104_s23  ;;  %p3112_p0 = scmp.lt.s32.totalorder %s520_s24, %s520_s24 }
  0x46   : > { %p3113_p2 = scmp.lt.s32.totalorder %s3104_s23, %s3104_s23 }
  0x47   : > { %p3107_p12 = pnand %p3105_p11, %p3491_p7 }
  0x48   : > { %2790 = dma.hbm_to_vmem [thread:$0]  (!%p3485_p6), %s3900_s8, 2048, %s536_s26, [#allocation14], %s3334_s15, %s3334_s15, %s3335_s17  }
  0x49   : > { %p3108_p13 = pneg %p3107_p12  ;;  %p3114_p4 = por %p3113_p2, %p3112_p0 }
  0x4b   : > { %p3115_p9 = pnand %p3114_p4, %p3108_p13 }
  0x4d   : > { %3118 = shalt.err (!%p3115_p9)
}
  0x4e   : > { %s3901_s13 = smov 128   ;;  %s3902_s6 = sld [smem:[#allocation34_spill]] }
  0x4f   : > { %s3130_s22 = scalar_lea.vmem %s558_s16, 1024  ;;  %p3138_p12 = scmp.lt.s32.totalorder %s558_s16, %s558_s16 }
  0x50   : > { %p3131_p8 = scmp.ne.s32.totalorder %s558_s16, %s3130_s22  ;;  %p3139_p0 = scmp.lt.s32.totalorder %s3130_s22, %s3130_s22 }
  0x52   : > { %p3133_p10 = pnand %p3131_p8, %p3491_p7  ;;  %p3140_p13 = por %p3139_p0, %p3138_p12 }
  0x54   : > { %2787 = dma.hbm_to_vmem [thread:$0]  (!%p3485_p6), %s3902_s6, 2048, %s520_s24, [#allocation11], %s3901_s13, %s3901_s13, %s3333_s25  }
  0x55   : > { %p3134_p11 = pneg %p3133_p10 }
  0x57   : > { %p3141_p2 = pnand %p3140_p13, %p3134_p11 }
  0x59   : > { %3144 = shalt.err (!%p3141_p2)
}
  0x5a   : > { %s3903_s12 = sld [smem:[#allocation36_spill]]  ;;  %s3338_s25 = smov [#allocation16]  }
  0x5b   : > { %s573_s24 = sshll.u32 %s3338_s25, 4  ;;  %s574_s24 = int_to_ptr.vmem [resolvable:$true] %s573_s24 }
  0x5c   : > { %s3156_s13 = scalar_lea.vmem %s574_s24, 1024  ;;  %p3164_p10 = scmp.lt.s32.totalorder %s574_s24, %s574_s24 }
  0x5d   : > { %p3157_p4 = scmp.ne.s32.totalorder %s574_s24, %s3156_s13  ;;  %p3165_p11 = scmp.lt.s32.totalorder %s3156_s13, %s3156_s13 }
  0x5f   : > { %p3159_p9 = pnand %p3157_p4, %p3491_p7  ;;  %p3166_p12 = por %p3165_p11, %p3164_p10 }
  0x60   : > { %2793 = dma.hbm_to_vmem [thread:$0]  (!%p3485_p6), %s3903_s12, 1024, %s558_s16, [#allocation14], %s3334_s15, %s3334_s15, %s3335_s17  }
  0x61   : > { %p3160_p8 = pneg %p3159_p9 }
  0x63   : > { %p3167_p0 = pnand %p3166_p12, %p3160_p8 }
  0x65   : > { %3170 = shalt.err (!%p3167_p0)
}
  0x66   : > { %s3904_s14 = sld [smem:[#allocation38_spill]]  ;;  %s2397_s18 = sadd.s32 4294967294, %s3327_s19  }
  0x67   : > { %s52_s2 = sadd.s32 1, %s3323_s0  ;;  %s61_s30 = sadd.s32 1, %s3315_s29 }
  0x68   : > { %p54_p7 = scmp.ge.s32.totalorder %s52_s2, 2  ;;  %p68_p13 = scmp.ne.s32.totalorder %s3315_s29, %s3311_s28 }
  0x69   : > { %p69_p2 = scmp.eq.s32.totalorder %s3327_s19, 0  ;;  %p74_p9 = scmp.ne.s32.totalorder %s3311_s28, %s3307_s27 }
  0x6a   : > { %s3937_s2 = smov (%p54_p7, %s52_s2), 0  ;;  %p468_p12 = scmp.eq.s32.totalorder %s2397_s18, 1 }
  0x6b   : > { %3905 = sst [smem:[#allocation28_spill]] %s3937_s2  ;;  %p3563_p4 = por %p69_p2, %p68_p13 }
  0x6c   : > { %2796 = dma.hbm_to_vmem [thread:$0]  (!%p3485_p6), %s3904_s14, 1024, %s574_s24, [#allocation17], %s3334_s15, %s3334_s15, %s3335_s17  }
  0x6d   : > { %s56_s15 = ssub.s32 %s3323_s0, %s3937_s2  ;;  %p462_p6 = scmp.eq.s32.totalorder %s3471_s1, 1 }
  0x6e   : > { %p59_p8 = scmp.eq.s32.totalorder %s56_s15, 0  ;;  %p3574_p10 = por %p3879_p1, %p74_p9 }
  0x6f   : > { %p3578_p11 = por %p462_p6, %p68_p13  ;;  %p3585_p0 = por %p468_p12, %p74_p9 }
  0x70   : > { %s3583_s21 = scalar_select %p59_p8, %s3315_s29, %s61_s30  }
  0x71   : > { %p2814_p7 = scmp.lt.s32.totalorder %s3327_s19, 2  ;;  %s596_s24 = sand.u32 1, %s3315_s29  }
  0x72   : > { %3909 = sst [smem:[#allocation29_spill]] %s3583_s21  ;;  %s2407_s13 = sshll.u32 %s3323_s0, 7 }
  0x73   : > { %s2406_s26 = sshll.u32 %s596_s24, 3  ;;  %s3911_s4 = sld [smem:[#allocation30_spill]] }
  0x74   : > { %s600_s8 = scalar_lea.vmem [#allocation4], %s2406_s26  ;;  %p3597_p13 = pnand %p2814_p7, %p3563_p4 }
  0x75   : > { %s608_s12 = sshll.u32 %s600_s8, 4  ;;  %s3913_s2 = sld [smem:[#allocation31_spill]]  ;;  %s609_s12 = int_to_ptr.vmem [resolvable:$true] %s608_s12 }
  0x76   : > { %s597_s0 = scalar_lea.sflag [#allocation5], %s596_s24  ;;  %p3173_p2 = pneg %p3597_p13 }
  0x77   : > { %s3184_s16 = scalar_lea.vmem %s609_s12, 128 }
  0x78   : > { %p3185_p9 = scmp.ne.s32.totalorder %s609_s12, %s3184_s16 }
  0x79   : > { %s606_s6 = scalar_lea.hbm %s3911_s4, %s2407_s13  ;;  %s3339_s4 = smov [#allocation4]  }
  0x7a   : > { %p3187_p6 = pnand %p3185_p9, %p3173_p2  ;;  %s3189_s8 = sshll.u32 %s3339_s4, 4  ;;  %s3190_s8 = int_to_ptr.vmem [resolvable:$false] %s3189_s8 }
  0x7b   : > { %s3604_s21 = scalar_lea.hbm %s3913_s2, %s2407_s13  ;;  %s3191_s22 = scalar_lea.vmem %s3190_s8, 256 }
  0x7c   : > { %p3188_p4 = pneg %p3187_p6  ;;  %p3192_p8 = scmp.lt.s32.totalorder %s609_s12, %s3190_s8 }
  0x7d   : > { %p3193_p12 = scmp.lt.s32.totalorder %s3191_s22, %s3184_s16 }
  0x7f   : > { %p3194_p7 = por %p3193_p12, %p3192_p8 }
  0x81   : > { %p3195_p5 = pnand %p3194_p7, %p3188_p4 }
  0x83   : > { %3198 = shalt.err (!%p3195_p5)
}
  0x84   : > { %2800 = dma.hbm_to_vmem [thread:$0]  (!%p3597_p13), %s606_s6, 128, %s609_s12, %s597_s0  }
  0x85   : > { %s615_s2 = sand.u32 1, %s3327_s19   ;;  %s619_s24 = scalar_lea.vmem [#allocation7], %s2406_s26 }
  0x86   : > { %s626_s13 = sshll.u32 %s619_s24, 4  ;;  %s616_s15 = scalar_lea.sflag [#allocation8], %s615_s2  ;;  %s627_s13 = int_to_ptr.vmem [resolvable:$true] %s626_s13 }
  0x87   : > { %s3212_s18 = scalar_lea.vmem %s627_s13, 128  ;;  %s3340_s30 = smov [#allocation7]  }
  0x88   : > { %p3213_p9 = scmp.ne.s32.totalorder %s627_s13, %s3212_s18  ;;  %s3217_s16 = sshll.u32 %s3340_s30, 4  ;;  %s3218_s16 = int_to_ptr.vmem [resolvable:$false] %s3217_s16 }
  0x89   : > { %s3219_s4 = scalar_lea.vmem %s3218_s16, 256  ;;  %p3220_p5 = scmp.lt.s32.totalorder %s627_s13, %s3218_s16 }
  0x8a   : > { %p3215_p6 = pnand %p3213_p9, %p3173_p2  ;;  %p3221_p4 = scmp.lt.s32.totalorder %s3219_s4, %s3212_s18 }
  0x8c   : > { %p3216_p1 = pneg %p3215_p6  ;;  %p3222_p8 = por %p3221_p4, %p3220_p5 }
  0x8e   : > { %p3223_p12 = pnand %p3222_p8, %p3216_p1 }
  0x90   : > { %3226 = shalt.err (!%p3223_p12)
}
  0x91   : > { %2803 = dma.hbm_to_vmem [thread:$0]  (!%p3597_p13), %s3604_s21, 128, %s627_s13, %s616_s15  }
  0x92   : > { %635 = sbr.rel (%p3476_p3) target bundleno = 3185 (0xc71), region = 92  ;;  %s3623_s6 = sand.u32 (!%p3476_p3), 1, %s3311_s28  }
  0x93   : > { %s3626_s12 = sshll.u32 (!%p3476_p3), %s3623_s6, 3  ;;  %s638_s0 = scalar_lea.sflag (!%p3476_p3), [#allocation5], %s3623_s6 }
  0x94   : > { %s641_s26 = scalar_lea.vmem (!%p3476_p3), [#allocation4], %s3626_s12 }
  0x97   : > { %3278 = dma.done.wait (%p3574_p10), %s638_s0, 128  }
  0x98   : > { %3280 = vsyncadd (%p3574_p10), %s638_s0, 4294967168  ;;  %s646_s14 = sand.u32 1, %s3471_s1   ;;  %s650_s21 = scalar_lea.vmem [#allocation7], %s3626_s12 }
  0x99   : > { %s647_s20 = scalar_lea.sflag [#allocation8], %s646_s14 }
  0x9a   : > { %3282 = dma.done.wait (%p3574_p10), %s647_s20, 128  }
  0x9b   : > { %3284 = vsyncadd (%p3574_p10), %s647_s20, 4294967168  ;;  %p3914_p1 = scmp.eq.s32.totalorder %s3471_s1, 0 }
  0x9d   : > { %3286 = dma.done.wait (%p3914_p1), [#allocation8], 2048   ;;  %p3915_p3 = pmov %p3914_p1 }
  0x9e   : > { %p3916_p13 = pmov %p3914_p1 }
  0x9f   : > { %3288 = vsyncadd (%p3915_p3), [#allocation8], 4294965248 }
  0xa0   : > { %3290 = dma.done.wait (%p3916_p13), [#allocation11], 4096   ;;  %p3917_p2 = pmov %p3914_p1 }
  0xa1   : > { %p3918_p7 = pmov %p3914_p1 }
  0xa2   : > { %3292 = vsyncadd (%p3917_p2), [#allocation11], 4294963200 }
  0xa3   : > { %3294 = dma.done.wait (%p3918_p7), [#allocation14], 3072   ;;  %p3919_p9 = pmov %p3914_p1 }
  0xa4   : > { %p3920_p10 = pmov %p3914_p1 }
  0xa5   : > { %3296 = vsyncadd (%p3919_p9), [#allocation14], 4294964224 }
  0xa6   : > { %3298 = dma.done.wait (%p3920_p10), [#allocation17], 1024   ;;  %p3921_p6 = pmov %p3914_p1 }
  0xa7   : > { %v3341_v0 = vmov 0   ;;  %v2883_v1 = vld [vmem:[#allocation10 + $0x74] ss:$8 sps:$4 sm:$0xff]   ;;  %v2885_v2 = vld [vmem:[#allocation10 + $0x70] ss:$8 sps:$4 sm:$0xff]   ;;  %v3663_v35 = vld [vmem:[%s641_s26] sm:$0xff]  ;;  %v757_v37 = vlaneseq }
  0xa8   : > { %3300 = vsyncadd (%p3921_p6), [#allocation17], 4294966272  ;;  %879 = vmatprep.mubr.bf16.mxu0 %v3341_v0  ;;  %1028 = vmatprep.mubr.bf16.mxu1 %v3341_v0  ;;  %v2886_v3 = vld [vmem:[#allocation10 + $0x64] ss:$8 sps:$4 sm:$0xff]   ;;  %v2888_v4 = vld [vmem:[#allocation10 + $0x60] ss:$8 sps:$4 sm:$0xff]   ;;  %v1269_v36 = vpack.c.bf16 %v3663_v35, %v3663_v35 }
  0xa9   : > { %847 = vmatprep.subr.bf16.mxu0 %v2883_v1  ;;  %v2889_v5 = vld [vmem:[#allocation10 + $0x54] ss:$8 sps:$4 sm:$0xff]   ;;  %v2891_v6 = vld [vmem:[#allocation10 + $0x50] ss:$8 sps:$4 sm:$0xff]   ;;  %v2892_v7 = vld [vmem:[#allocation10 + $0x44] ss:$8 sps:$4 sm:$0xff]  }
  0xaa   : > { %848 = vmatpush1.bf16.msra.mxu0 %v2885_v2  ;;  %v2894_v8 = vld [vmem:[#allocation10 + $0x40] ss:$8 sps:$4 sm:$0xff]   ;;  %v2895_v9 = vld [vmem:[#allocation10 + $0x34] ss:$8 sps:$4 sm:$0xff]   ;;  %v2897_v10 = vld [vmem:[#allocation10 + $0x30] ss:$8 sps:$4 sm:$0xff]  }
  0xab   : > { %849 = vmatprep.subr.bf16.mxu0 %v2886_v3  ;;  %v2898_v11 = vld [vmem:[#allocation10 + $0x24] ss:$8 sps:$4 sm:$0xff]   ;;  %v2900_v12 = vld [vmem:[#allocation10 + $0x20] ss:$8 sps:$4 sm:$0xff]   ;;  %v2901_v13 = vld [vmem:[#allocation10 + $0x14] ss:$8 sps:$4 sm:$0xff]  }
  0xac   : > { %v2903_v14 = vld [vmem:[#allocation10 + $0x10] ss:$8 sps:$4 sm:$0xff]   ;;  %v2904_v15 = vld [vmem:[#allocation10 + $0x4] ss:$8 sps:$4 sm:$0xff]   ;;  %v2906_v16 = vld [vmem:[#allocation10] ss:$8 sps:$4 sm:$0xff]  }
  0xad   : > { %v737_v17 = vld [vmem:[%s650_s21] sm:$0xff]  ;;  %v2912_v21 = vld [vmem:[#allocation9 + $0x64] ss:$8 sps:$4 sm:$0xff]   ;;  %v2910_v22 = vld [vmem:[#allocation9 + $0x60] ss:$8 sps:$4 sm:$0xff]   ;;  %v758_v38 = vshrl.u32 %v757_v37, 7 }
  0xae   : > { %850 = vmatpush1.bf16.msra.mxu0 %v2888_v4  ;;  %v2909_v18 = vld [vmem:[#allocation9 + $0x74] ss:$8 sps:$4 sm:$0xff]   ;;  %v2907_v19 = vld [vmem:[#allocation9 + $0x70] ss:$8 sps:$4 sm:$0xff]   ;;  %v3658_v20 = vpack.c.bf16 %v737_v17, %v737_v17  ;;  %v2918_v25 = vld [vmem:[#allocation9 + $0x44] ss:$8 sps:$4 sm:$0xff]  }
  0xaf   : > { %851 = vmatprep.subr.bf16.mxu0 %v2889_v5  ;;  %v2915_v23 = vld [vmem:[#allocation9 + $0x54] ss:$8 sps:$4 sm:$0xff]   ;;  %v2913_v24 = vld [vmem:[#allocation9 + $0x50] ss:$8 sps:$4 sm:$0xff]   ;;  %v2916_v26 = vld [vmem:[#allocation9 + $0x40] ss:$8 sps:$4 sm:$0xff]  }
  0xb0   : > { %v2919_v27 = vld [vmem:[#allocation9 + $0x30] ss:$8 sps:$4 sm:$0xff]   ;;  %v2921_v28 = vld [vmem:[#allocation9 + $0x34] ss:$8 sps:$4 sm:$0xff]   ;;  %v2924_v29 = vld [vmem:[#allocation9 + $0x24] ss:$8 sps:$4 sm:$0xff]  }
  0xb1   : > { %v2922_v30 = vld [vmem:[#allocation9 + $0x20] ss:$8 sps:$4 sm:$0xff]   ;;  %v2927_v31 = vld [vmem:[#allocation9 + $0x14] ss:$8 sps:$4 sm:$0xff]   ;;  %v2925_v32 = vld [vmem:[#allocation9 + $0x10] ss:$8 sps:$4 sm:$0xff]  }
  0xb2   : > { %852 = vmatpush1.bf16.msra.mxu0 %v2891_v6  ;;  %v2930_v33 = vld [vmem:[#allocation9 + $0x4] ss:$8 sps:$4 sm:$0xff]   ;;  %v2928_v34 = vld [vmem:[#allocation9] ss:$8 sps:$4 sm:$0xff]   ;;  %v3668_v39 = vsub.s32 0, %v758_v38  ;;  %v3673_v41 = vsub.s32 1, %v758_v38 }
  0xb3   : > { %853 = vmatprep.subr.bf16.mxu0 %v2892_v7  ;;  %v755_v40 = vld [vmem:[%s3861_s5] sm:$0x3]  ;;  %v2931_v50 = vld [vmem:[#allocation12 + $0x74] ss:$8 sps:$4 sm:$0xff]   ;;  %v2934_v52 = vld [vmem:[#allocation12 + $0x64] ss:$8 sps:$4 sm:$0xff]  }
  0xb4   : > { %v760_v42 = vrot.slane %v755_v40, %v3668_v39  ;;  %v764_v43 = vrot.slane %v755_v40, %v3673_v41  ;;  %v2933_v51 = vld [vmem:[#allocation12 + $0x70] ss:$8 sps:$4 sm:$0xff]   ;;  %996 = vmatprep.subr.bf16.mxu1 %v2931_v50  ;;  %v2936_v53 = vld [vmem:[#allocation12 + $0x60] ss:$8 sps:$4 sm:$0xff]   ;;  %v2937_v54 = vld [vmem:[#allocation12 + $0x54] ss:$8 sps:$4 sm:$0xff]  }
  0xb5   : > { %997 = vmatpush1.bf16.msra.mxu1 %v2933_v51  ;;  %v2939_v55 = vld [vmem:[#allocation12 + $0x50] ss:$8 sps:$4 sm:$0xff]   ;;  %v2940_v56 = vld [vmem:[#allocation12 + $0x44] ss:$8 sps:$4 sm:$0xff]   ;;  %v2942_v57 = vld [vmem:[#allocation12 + $0x40] ss:$8 sps:$4 sm:$0xff]  }
  0xb6   : > { %854 = vmatpush1.bf16.msra.mxu0 %v2894_v8  ;;  %998 = vmatprep.subr.bf16.mxu1 %v2934_v52  ;;  %v2943_v58 = vld [vmem:[#allocation12 + $0x34] ss:$8 sps:$4 sm:$0xff]   ;;  %v2945_v59 = vld [vmem:[#allocation12 + $0x30] ss:$8 sps:$4 sm:$0xff]   ;;  %v2946_v60 = vld [vmem:[#allocation12 + $0x24] ss:$8 sps:$4 sm:$0xff]  }
  0xb7   : > { %855 = vmatprep.subr.bf16.mxu0 %v2895_v9  ;;  %v2948_v61 = vld [vmem:[#allocation12 + $0x20] ss:$8 sps:$4 sm:$0xff]   ;;  %v2949_v62 = vld [vmem:[#allocation12 + $0x14] ss:$8 sps:$4 sm:$0xff]   ;;  %v2951_v63 = vld [vmem:[#allocation12 + $0x10] ss:$8 sps:$4 sm:$0xff]  }
  0xb8   : > { %v2954_v1 = vld [vmem:[#allocation12] ss:$8 sps:$4 sm:$0xff]   ;;  %v3342_v2 = vmov 0.0   ;;  %v3685_v3 = vld [vmem:[%s3859_s3] sm:$0x3]  ;;  %vm3343_vm0 = vmmov 0  }
  0xb9   : > { %999 = vmatpush1.bf16.msra.mxu1 %v2936_v53  ;;  %v1295_v4 = vrot.slane %v3685_v3, %v3673_v41  ;;  %vm1133_vm1 = vcmask 60416   ;;  %v1291_v52 = vrot.slane %v3685_v3, %v3668_v39  ;;  %vm1544_vm2 = vcmask 1043456   ;;  %s3922_s14 = sld [smem:[#allocation37_spill]]  ;;  %s731_s30 = scalar_lea.vmem [#allocation18], %s3626_s12 }
  0xba   : > { %856 = vmatpush1.bf16.msra.mxu0 %v2897_v10  ;;  %1000 = vmatprep.subr.bf16.mxu1 %v2937_v54  ;;  %vm1527_vm3 = vcmask 64512   ;;  %s3923_s1 = sld [smem:[#allocation39_spill]]  ;;  %s2236_s16 = sshll.u32 %s731_s30, 4  ;;  %s2237_s16 = int_to_ptr.vmem [resolvable:$true] %s2236_s16 }
  0xbb   : > { %857 = vmatprep.subr.bf16.mxu0 %v2898_v11  ;;  %s3924_s17 = sld [smem:[#allocation26_spill]]  ;;  %s2222_s20 = scalar_lea.sflag [#allocation6], %s3623_s6 }
  0xbc   : > { %s3925_s2 = sld [smem:[#allocation40_spill]]  ;;  %s3227_s21 = scalar_lea.vmem %s2237_s16, 128 }
  0xbd   : > { %1001 = vmatpush1.bf16.msra.mxu1 %v2939_v55  ;;  %s3926_s15 = sld [smem:[#allocation41_spill]]  ;;  %p3228_p5 = scmp.ne.s32.totalorder %s2237_s16, %s3227_s21 }
  0xbe   : > { %858 = vmatpush1.bf16.msra.mxu0 %v2900_v12  ;;  %1002 = vmatprep.subr.bf16.mxu1 %v2940_v56  ;;  %s3927_s26 = sld [smem:[#allocation42_spill]] }
  0xbf   : > { %859 = vmatprep.subr.bf16.mxu0 %v2901_v13  ;;  %p3229_p4 = pnand %p3228_p5, %p3578_p11 }
  0xc1   : > { %1003 = vmatpush1.bf16.msra.mxu1 %v2942_v57  ;;  %s2559_s18 = sshll.u32 %s3924_s17, 7  ;;  %p3230_p8 = pneg %p3229_p4 }
  0xc2   : > { %860 = vmatpush1.bf16.msra.mxu0 %v2903_v14  ;;  %1004 = vmatprep.subr.bf16.mxu1 %v2943_v58 }
  0xc3   : > { %861 = vmatprep.subr.bf16.mxu0 %v2904_v15 }
  0xc5   : > { %1005 = vmatpush1.bf16.msra.mxu1 %v2945_v59  ;;  %v904_v59 = vld [vmem:[%s3863_s7] sm:$0x3] }
  0xc6   : > { %862 = vmatpush1.bf16.msra.mxu0 %v2906_v16  ;;  %1006 = vmatprep.subr.bf16.mxu1 %v2946_v60  ;;  %v909_v60 = vrot.slane %v904_v59, %v3668_v39 }
  0xc7   : > { %1378 = vmatprep.subr.bf16.mxu0 %v2909_v18 }
  0xc9   : > { %880 = vmatmul.mubr.bf16.vlgmr.msra.gmra.mxu0 %v3658_v20  ;;  %1007 = vmatpush1.bf16.msra.mxu1 %v2948_v61  ;;  %v913_v61 = vrot.slane %v904_v59, %v3673_v41 }
  0xca   : > { %1379 = vmatpush1.bf16.msra.mxu0 %v2907_v19  ;;  %1410 = vmatprep.mubr.bf16.mxu0 %v3341_v0  ;;  %v2952_v0 = vld [vmem:[#allocation12 + $0x4] ss:$8 sps:$4 sm:$0xff]  }
  0xcb   : > { %1380 = vmatprep.subr.bf16.mxu0 %v2912_v21  ;;  %1008 = vmatprep.subr.bf16.mxu1 %v2949_v62 }
  0xcd   : > { %1009 = vmatpush1.bf16.msra.mxu1 %v2951_v63 }
  0xce   : > { %1381 = vmatpush1.bf16.msra.mxu0 %v2910_v22  ;;  %1010 = vmatprep.subr.bf16.mxu1 %v2952_v0 }
  0xcf   : > { %1382 = vmatprep.subr.bf16.mxu0 %v2915_v23 }
  0xd1   : > { %1011 = vmatpush1.bf16.msra.mxu1 %v2954_v1 }
  0xd2   : > { %1383 = vmatpush1.bf16.msra.mxu0 %v2913_v24  ;;  %2656 = vmatprep.subr.bf16.mxu1 %v3342_v2 }
  0xd3   : > { %1384 = vmatprep.subr.bf16.mxu0 %v2918_v25 }
  0xd4   : > { %1029 = vmatmul.mubr.bf16.vlgmr.msra.gmra.mxu1 %v3658_v20 }
  0xd5   : > { %2672 = vmatprep.mubr.msk.bf16.mxu1 %vm3343_vm0, %v3342_v2 }
  0xd6   : > { %1385 = vmatpush1.bf16.msra.mxu0 %v2916_v26 }
  0xd7   : > { %1386 = vmatprep.subr.bf16.mxu0 %v2921_v28 }
  0xda   : > { %1387 = vmatpush1.bf16.msra.mxu0 %v2919_v27 }
  0xdb   : > { %1388 = vmatprep.subr.bf16.mxu0 %v2924_v29 }
  0xde   : > { %1389 = vmatpush1.bf16.msra.mxu0 %v2922_v30 }
  0xdf   : > { %1390 = vmatprep.subr.bf16.mxu0 %v2927_v31 }
  0xe2   : > { %1391 = vmatpush1.bf16.msra.mxu0 %v2925_v32 }
  0xe3   : > { %1392 = vmatprep.subr.bf16.mxu0 %v2930_v33 }
  0xe6   : > { %1393 = vmatpush1.bf16.msra.mxu0 %v2928_v34 }
  0xe7   : > { %2702 = vmatprep.subr.bf16.mxu0 %v3342_v2 }
  0xe9   : > { %1411 = vmatmul.mubr.bf16.vlgmr.msra.gmra.mxu0 %v1269_v36 }
  0xea   : > { %2704 = vmatprep.mubr.msk.bf16.mxu0 %vm3343_vm0, %v3342_v2 }
 0x189   : > { %v881_v44 = vpop.f32.mrf.mxu0 }
 0x18a   : > { %v882_v45 = vadd.f32 %v881_v44, %v760_v42 }
 0x18b   : > { %v883_v46 = vpop.f32.mrf.mxu0 }
 0x18c   : > { %v3677_v47 = vadd.f32 %v883_v46, %v764_v43  ;;  %1037 = vxpose.xlu0.b32.start.end [1/1] (short) %v882_v45, 128 }
 0x18d   : > { %v885_v48 = vpop.f32.mrf.mxu0 }
 0x18f   : > { %v886_v49 = vpop.f32.mrf.mxu0 }
 0x194   : > { %v1030_v62 = vpop.f32.mrf.mxu1 }
 0x195   : > { %v1031_v63 = vadd.f32 %v1030_v62, %v909_v60 }
 0x196   : > { %v1032_v0 = vpop.f32.mrf.mxu1 }
 0x197   : > { %v1150_v1 = vpack.c.bf16 %v1031_v63, %v1031_v63  ;;  %v1033_v3 = vadd.f32 %v1032_v0, %v913_v61 }
 0x199   : > { %1151 = vst [vmem:[#allocation3] sm:$0xf] %v1150_v1 }
 0x1a9   : > { %v3689_v5 = vpop.f32.mrf.mxu0 }
 0x1aa   : > { %v1413_v54 = vadd.f32 %v3689_v5, %v1291_v52  ;;  %v1265_v5 = vpack.c.bf16 %v1033_v3, %v1033_v3 }
 0x1ab   : > { %v1414_v6 = vpop.f32.mrf.mxu0 }
 0x1ac   : > { %v3691_v7 = vadd.f32 %v1414_v6, %v1295_v4  ;;  %v1419_v56 = vmul.f32 0.17677669, %v1413_v54  ;;  %v1034_v4 = vpop.f32.mrf.mxu1  ;;  %1267 = vst [vmem:[#allocation3 + $0x4] sm:$0xf] %v1265_v5 }
 0x1ad   : > { %v1416_v8 = vpop.f32.mrf.mxu0 }
 0x1ae   : > { %v1421_v58 = vpack.c.bf16 %v1419_v56, %v1419_v56  ;;  %v1035_v6 = vpop.f32.mrf.mxu1  ;;  %v1540_v8 = vld [vmem:[#allocation3] sm:$0xf]  ;;  %v1420_v4 = vmul.f32 0.17677669, %v3691_v7 }
 0x1af   : > { %v1417_v9 = vpop.f32.mrf.mxu0 }
 0x1b0   : > { %v1546_v9 = vsel %vm1544_vm2, %v1540_v8, 0  ;;  %v1422_v6 = vpack.c.bf16 %v1420_v4, %v1420_v4  ;;  %v2991_v4 = vld [vmem:[#allocation15 + $0x18] sm:$0xff]  }
 0x208   : > { %v1053_v10 = vpop.trf.xlu0 }
 0x209   : > { %v2562_v11 = vpack.c.bf16 %v1053_v10, %v1053_v10  ;;  %v1707_v10 = vld [vmem:[#allocation3 + $0x4] sm:$0xf] }
 0x20b   : > { %1134 = vst.msk [vmem:[#allocation2] sm:$0xf] %vm1133_vm1, %v2562_v11  ;;  %v1712_v11 = vsel %vm1544_vm2, %v1707_v10, 0 }
 0x20c   : > { %v1054_v12 = vpop.trf.xlu0  ;;  %2703 = vmatpush3.bf16.msra.mxu0 %v1712_v11 }
 0x20d   : > { %v2563_v13 = vpack.c.bf16 %v1054_v12, %v1054_v12 }
 0x20f   : > { %1135 = vst.msk [vmem:[#allocation2 + $0x4] sm:$0xf] %vm1133_vm1, %v2563_v13 }
 0x210   : > { %v1055_v14 = vpop.trf.xlu0 }
 0x211   : > { %v2564_v15 = vpack.c.bf16 %v1055_v14, %v1055_v14 }
 0x213   : > { %1136 = vst.msk [vmem:[#allocation2 + $0x8] sm:$0xf] %vm1133_vm1, %v2564_v15 }
 0x214   : > { %v1056_v16 = vpop.trf.xlu0 }
 0x215   : > { %v2565_v17 = vpack.c.bf16 %v1056_v16, %v1056_v16 }
 0x216   : > { %v2962_v57 = vld [vmem:[#allocation2] sm:$0xff]  }
 0x217   : > { %1137 = vst.msk [vmem:[#allocation2 + $0xc] sm:$0xf] %vm1133_vm1, %v2565_v17 }
 0x218   : > { %v1057_v18 = vpop.trf.xlu0 }
 0x219   : > { %v2566_v19 = vpack.c.bf16 %v1057_v18, %v1057_v18 }
 0x21b   : > { %1138 = vst.msk [vmem:[#allocation2 + $0x10] sm:$0xf] %vm1133_vm1, %v2566_v19 }
 0x21c   : > { %v1058_v20 = vpop.trf.xlu0 }
 0x21d   : > { %v2567_v21 = vpack.c.bf16 %v1058_v20, %v1058_v20 }
 0x21e   : > { %v2961_v55 = vld [vmem:[#allocation2 + $0x8] sm:$0xff]  }
 0x21f   : > { %1139 = vst.msk [vmem:[#allocation2 + $0x14] sm:$0xf] %vm1133_vm1, %v2567_v21 }
 0x220   : > { %v1059_v22 = vpop.trf.xlu0 }
 0x221   : > { %v2568_v23 = vpack.c.bf16 %v1059_v22, %v1059_v22 }
 0x223   : > { %1140 = vst.msk [vmem:[#allocation2 + $0x18] sm:$0xf] %vm1133_vm1, %v2568_v23 }
 0x224   : > { %v1060_v24 = vpop.trf.xlu0 }
 0x225   : > { %v2569_v25 = vpack.c.bf16 %v1060_v24, %v1060_v24 }
 0x226   : > { %v2960_v53 = vld [vmem:[#allocation2 + $0x10] sm:$0xff]  }
 0x227   : > { %1141 = vst.msk [vmem:[#allocation2 + $0x1c] sm:$0xf] %vm1133_vm1, %v2569_v25 }
 0x228   : > { %v1061_v26 = vpop.trf.xlu0 }
 0x229   : > { %v2570_v27 = vpack.c.bf16 %v1061_v26, %v1061_v26 }
 0x22b   : > { %1142 = vst.msk [vmem:[#allocation2 + $0x20] sm:$0xf] %vm1133_vm1, %v2570_v27 }
 0x22c   : > { %v1062_v28 = vpop.trf.xlu0 }
 0x22d   : > { %v2571_v29 = vpack.c.bf16 %v1062_v28, %v1062_v28 }
 0x22e   : > { %v2959_v51 = vld [vmem:[#allocation2 + $0x18] sm:$0xff]  }
 0x22f   : > { %1143 = vst.msk [vmem:[#allocation2 + $0x24] sm:$0xf] %vm1133_vm1, %v2571_v29 }
 0x230   : > { %v1063_v30 = vpop.trf.xlu0 }
 0x231   : > { %v2572_v31 = vpack.c.bf16 %v1063_v30, %v1063_v30 }
 0x233   : > { %1144 = vst.msk [vmem:[#allocation2 + $0x28] sm:$0xf] %vm1133_vm1, %v2572_v31 }
 0x234   : > { %v1064_v32 = vpop.trf.xlu0 }
 0x235   : > { %v2573_v33 = vpack.c.bf16 %v1064_v32, %v1064_v32 }
 0x236   : > { %v2958_v50 = vld [vmem:[#allocation2 + $0x20] sm:$0xff]  }
 0x237   : > { %1145 = vst.msk [vmem:[#allocation2 + $0x2c] sm:$0xf] %vm1133_vm1, %v2573_v33 }
 0x238   : > { %v1065_v34 = vpop.trf.xlu0 }
 0x239   : > { %v2574_v36 = vpack.c.bf16 %v1065_v34, %v1065_v34 }
 0x23b   : > { %1146 = vst.msk [vmem:[#allocation2 + $0x30] sm:$0xf] %vm1133_vm1, %v2574_v36 }
 0x23c   : > { %v1066_v38 = vpop.trf.xlu0 }
 0x23d   : > { %v2575_v40 = vpack.c.bf16 %v1066_v38, %v1066_v38 }
 0x23e   : > { %v2957_v49 = vld [vmem:[#allocation2 + $0x28] sm:$0xff]  }
 0x23f   : > { %1147 = vst.msk [vmem:[#allocation2 + $0x34] sm:$0xf] %vm1133_vm1, %v2575_v40 }
 0x240   : > { %v1067_v42 = vpop.trf.xlu0 }
 0x241   : > { %v2576_v43 = vpack.c.bf16 %v1067_v42, %v1067_v42 }
 0x243   : > { %1148 = vst.msk [vmem:[#allocation2 + $0x38] sm:$0xf] %vm1133_vm1, %v2576_v43 }
 0x244   : > { %v1068_v44 = vpop.trf.xlu0 }
 0x245   : > { %v2577_v45 = vpack.c.bf16 %v1068_v44, %v1068_v44 }
 0x246   : > { %v2956_v48 = vld [vmem:[#allocation2 + $0x30] sm:$0xff]  }
 0x247   : > { %1149 = vst.msk [vmem:[#allocation2 + $0x3c] sm:$0xf] %vm1133_vm1, %v2577_v45 }
 0x24e   : > { %v2955_v46 = vld [vmem:[#allocation2 + $0x38] sm:$0xff]  }
 0x24f   : > { %2657 = vmatpush3.bf16.msra.mxu1 %v2955_v46 }
 0x250   : > { %2658 = vmatprep.subr.bf16.mxu1 %v3342_v2 }
 0x253   : > { %2659 = vmatpush3.bf16.msra.mxu1 %v2956_v48 }
 0x254   : > { %2660 = vmatprep.subr.bf16.mxu1 %v3342_v2 }
 0x257   : > { %2661 = vmatpush3.bf16.msra.mxu1 %v2957_v49 }
 0x258   : > { %2662 = vmatprep.subr.bf16.mxu1 %v3342_v2 }
 0x25b   : > { %2663 = vmatpush3.bf16.msra.mxu1 %v2958_v50 }
 0x25c   : > { %2664 = vmatprep.subr.bf16.mxu1 %v3342_v2 }
 0x25f   : > { %2665 = vmatpush3.bf16.msra.mxu1 %v2959_v51 }
 0x260   : > { %2666 = vmatprep.subr.bf16.mxu1 %v3342_v2 }
 0x263   : > { %2667 = vmatpush3.bf16.msra.mxu1 %v2960_v53 }
 0x264   : > { %2668 = vmatprep.subr.bf16.mxu1 %v3342_v2 }
 0x267   : > { %2669 = vmatpush3.bf16.msra.mxu1 %v2961_v55 }
 0x268   : > { %2670 = vmatprep.subr.bf16.mxu1 %v3342_v2 }
 0x26b   : > { %2671 = vmatpush3.bf16.msra.mxu1 %v2962_v57 }
 0x26c   : > { %2676 = vmatprep.subr.bf16.mxu1 %v3342_v2 }
 0x26e   : > { %2673 = vmatmul.mubr.bf16.vlgmr.msra.gmra.mxu1 %v1421_v58 }
 0x26f   : > { %2678 = vmatprep.mubr.msk.bf16.mxu1 %vm3343_vm0, %v3342_v2  ;;  %2677 = vmatpush3.bf16.msra.mxu1 %v1546_v9 }
 0x270   : > { %2682 = vmatprep.subr.bf16.mxu1 %v3342_v2 }
 0x32e   : > { %v1521_v39 = vpop.f32.mrf.mxu1 }
 0x32f   : > { %v1528_v41 = vsel %vm1527_vm3, %v1521_v39, -inf }
 0x330   : > { %1529 = vmax.xlane.f32.xlu0 %v1528_v41  ;;  %v2674_v12 = vpop.f32.mrf.mxu1 }
 0x332   : > { %v1524_v13 = vpop.f32.mrf.mxu1 }
 0x334   : > { %v2675_v14 = vpop.f32.mrf.mxu1 }
 0x3b9   : > { %v1530_v15 = vpop.xlane.xlu0 %1529 }
 0x3ba   : > { %v1531_v16 = vsub.f32 %v1521_v39, %v1530_v15 }
 0x3bc   : > { %v1532_v17 = vmul.f32 1.442695, %v1531_v16 }
 0x3be   : > { %3003 = vpow2.f32 %v1532_v17 }
 0x3cb   : > { %v3004_v18 = vpop.eup %3003 }
 0x3cc   : > { %v1534_v19 = vsel %vm1527_vm3, %v3004_v18, 0.0 }
 0x3cd   : > { %1535 = vadd.xlane.f32.xlu1 %v1534_v19  ;;  %v2971_v19 = vld [vmem:[#allocation13 + $0x78] sm:$0xff]  }
 0x3ce   : > { %2616 = vmatprep.subr.bf16.mxu0 %v2971_v19 }
 0x400   : > { %1152 = vxpose.xlu1.b32.start.end [1/1] (short) %v3677_v47, 128 }
 0x456   : > { %v1536_v20 = vpop.xlane.xlu1 %1535 }
 0x457   : > { %3005 = vrcp.f32 %v1536_v20 }
 0x464   : > { %v3006_v21 = vpop.eup %3005 }
 0x465   : > { %v1538_v22 = vmul.f32 %v3006_v21, %v3004_v18 }
 0x467   : > { %v1539_v23 = vpack.c.bf16 %v1538_v22, %v1538_v22 }
 0x469   : > { %2679 = vmatmul.mubr.msk.bf16.vlgmr.msra.gmra.mxu1 %vm1527_vm3, %v1539_v23  ;;  %v2972_v23 = vld [vmem:[#allocation13 + $0x38] sm:$0xff]  }
 0x46a   : > { %2698 = vmatprep.mubr.msk.bf16.mxu1 %vm3343_vm0, %v3342_v2 }
 0x47c   : > { %v1168_v24 = vpop.trf.xlu1 }
 0x47d   : > { %v2578_v25 = vpack.c.bf16 %v1168_v24, %v1168_v24 }
 0x47f   : > { %1249 = vst.msk [vmem:[#allocation2 + $0x40] sm:$0xf] %vm1133_vm1, %v2578_v25  ;;  %v2973_v25 = vld [vmem:[#allocation13 + $0x70] sm:$0xff]  }
 0x480   : > { %v1169_v26 = vpop.trf.xlu1 }
 0x481   : > { %v2579_v27 = vpack.c.bf16 %v1169_v26, %v1169_v26  ;;  %v2974_v26 = vld [vmem:[#allocation13 + $0x30] sm:$0xff]  }
 0x483   : > { %1250 = vst.msk [vmem:[#allocation2 + $0x44] sm:$0xf] %vm1133_vm1, %v2579_v27  ;;  %v2975_v27 = vld [vmem:[#allocation13 + $0x68] sm:$0xff]  }
 0x484   : > { %v1170_v28 = vpop.trf.xlu1 }
 0x485   : > { %v2580_v47 = vpack.c.bf16 %v1170_v28, %v1170_v28  ;;  %v2976_v28 = vld [vmem:[#allocation13 + $0x28] sm:$0xff]  }
 0x487   : > { %1251 = vst.msk [vmem:[#allocation2 + $0x48] sm:$0xf] %vm1133_vm1, %v2580_v47  ;;  %v2977_v47 = vld [vmem:[#allocation13 + $0x60] sm:$0xff]  }
 0x488   : > { %v1171_v29 = vpop.trf.xlu1 }
 0x489   : > { %v2581_v30 = vpack.c.bf16 %v1171_v29, %v1171_v29  ;;  %v2978_v29 = vld [vmem:[#allocation13 + $0x20] sm:$0xff]  }
 0x48a   : > { %v2970_v5 = vld [vmem:[#allocation2 + $0x40] sm:$0xff]  }
 0x48b   : > { %1252 = vst.msk [vmem:[#allocation2 + $0x4c] sm:$0xf] %vm1133_vm1, %v2581_v30  ;;  %v2979_v30 = vld [vmem:[#allocation13 + $0x58] sm:$0xff]  }
 0x48c   : > { %v1172_v31 = vpop.trf.xlu1 }
 0x48d   : > { %v2582_v32 = vpack.c.bf16 %v1172_v31, %v1172_v31  ;;  %v2980_v31 = vld [vmem:[#allocation13 + $0x18] sm:$0xff]  }
 0x48f   : > { %1253 = vst.msk [vmem:[#allocation2 + $0x50] sm:$0xf] %vm1133_vm1, %v2582_v32  ;;  %v2981_v32 = vld [vmem:[#allocation13 + $0x50] sm:$0xff]  }
 0x490   : > { %v1173_v33 = vpop.trf.xlu1 }
 0x491   : > { %v2583_v34 = vpack.c.bf16 %v1173_v33, %v1173_v33  ;;  %v2982_v33 = vld [vmem:[#allocation13 + $0x10] sm:$0xff]  }
 0x492   : > { %v2969_v3 = vld [vmem:[#allocation2 + $0x48] sm:$0xff]  }
 0x493   : > { %1254 = vst.msk [vmem:[#allocation2 + $0x54] sm:$0xf] %vm1133_vm1, %v2583_v34  ;;  %v2983_v34 = vld [vmem:[#allocation13 + $0x48] sm:$0xff]  }
 0x494   : > { %v1174_v36 = vpop.trf.xlu1 }
 0x495   : > { %v2584_v38 = vpack.c.bf16 %v1174_v36, %v1174_v36  ;;  %v2984_v36 = vld [vmem:[#allocation13 + $0x8] sm:$0xff]  }
 0x497   : > { %1255 = vst.msk [vmem:[#allocation2 + $0x58] sm:$0xf] %vm1133_vm1, %v2584_v38  ;;  %v2985_v38 = vld [vmem:[#allocation13 + $0x40] sm:$0xff]  }
 0x498   : > { %v1175_v40 = vpop.trf.xlu1 }
 0x499   : > { %v2585_v42 = vpack.c.bf16 %v1175_v40, %v1175_v40  ;;  %v2986_v40 = vld [vmem:[#allocation13] sm:$0xff]  }
 0x49a   : > { %v2968_v1 = vld [vmem:[#allocation2 + $0x50] sm:$0xff]  }
 0x49b   : > { %1256 = vst.msk [vmem:[#allocation2 + $0x5c] sm:$0xf] %vm1133_vm1, %v2585_v42 }
 0x49c   : > { %v1176_v43 = vpop.trf.xlu1 }
 0x49d   : > { %v2586_v44 = vpack.c.bf16 %v1176_v43, %v1176_v43 }
 0x49f   : > { %1257 = vst.msk [vmem:[#allocation2 + $0x60] sm:$0xf] %vm1133_vm1, %v2586_v44 }
 0x4a0   : > { %v1177_v45 = vpop.trf.xlu1 }
 0x4a1   : > { %v2587_v46 = vpack.c.bf16 %v1177_v45, %v1177_v45 }
 0x4a2   : > { %v2967_v0 = vld [vmem:[#allocation2 + $0x58] sm:$0xff]  }
 0x4a3   : > { %1258 = vst.msk [vmem:[#allocation2 + $0x64] sm:$0xf] %vm1133_vm1, %v2587_v46 }
 0x4a4   : > { %v1178_v48 = vpop.trf.xlu1 }
 0x4a5   : > { %v2588_v49 = vpack.c.bf16 %v1178_v48, %v1178_v48 }
 0x4a7   : > { %1259 = vst.msk [vmem:[#allocation2 + $0x68] sm:$0xf] %vm1133_vm1, %v2588_v49  ;;  %v1931_v49 = vand.u32 127, %v757_v37  ;;  %v2987_v37 = vld [vmem:[#allocation15 + $0x38] sm:$0xff]  }
 0x4a8   : > { %v1179_v50 = vpop.trf.xlu1 }
 0x4a9   : > { %v2589_v51 = vpack.c.bf16 %v1179_v50, %v1179_v50  ;;  %vm1932_vm4 = vcmp.lt.s32.totalorder %v1931_v49, 32 }
 0x4aa   : > { %v2966_v63 = vld [vmem:[#allocation2 + $0x60] sm:$0xff]  }
 0x4ab   : > { %1260 = vst.msk [vmem:[#allocation2 + $0x6c] sm:$0xf] %vm1133_vm1, %v2589_v51  ;;  %v2518_v51 = vld [vmem:[%s3865_s9] ss:$0 sm:$0xff] }
 0x4ac   : > { %v1180_v52 = vpop.trf.xlu1 }
 0x4ad   : > { %v2590_v53 = vpack.c.bf16 %v1180_v52, %v1180_v52 }
 0x4af   : > { %1261 = vst.msk [vmem:[#allocation2 + $0x70] sm:$0xf] %vm1133_vm1, %v2590_v53 }
 0x4b0   : > { %v1181_v54 = vpop.trf.xlu1 }
 0x4b1   : > { %v2591_v55 = vpack.c.bf16 %v1181_v54, %v1181_v54 }
 0x4b2   : > { %v2965_v62 = vld [vmem:[#allocation2 + $0x68] sm:$0xff]  }
 0x4b3   : > { %1262 = vst.msk [vmem:[#allocation2 + $0x74] sm:$0xf] %vm1133_vm1, %v2591_v55 }
 0x4b4   : > { %v1182_v56 = vpop.trf.xlu1 }
 0x4b5   : > { %v2592_v57 = vpack.c.bf16 %v1182_v56, %v1182_v56 }
 0x4b7   : > { %1263 = vst.msk [vmem:[#allocation2 + $0x78] sm:$0xf] %vm1133_vm1, %v2592_v57  ;;  %v3776_v57 = vsel %vm1932_vm4, 1.0, %v3342_v2 }
 0x4b8   : > { %v1183_v58 = vpop.trf.xlu1 }
 0x4b9   : > { %v2593_v59 = vpack.c.bf16 %v1183_v58, %v1183_v58 }
 0x4ba   : > { %v2964_v61 = vld [vmem:[#allocation2 + $0x70] sm:$0xff]  }
 0x4bb   : > { %1264 = vst.msk [vmem:[#allocation2 + $0x7c] sm:$0xf] %vm1133_vm1, %v2593_v59 }
 0x4c2   : > { %v2963_v60 = vld [vmem:[#allocation2 + $0x78] sm:$0xff]  }
 0x4c3   : > { %2683 = vmatpush3.bf16.msra.mxu1 %v2963_v60  ;;  %v2988_v60 = vld [vmem:[#allocation15 + $0x30] sm:$0xff]  }
 0x4c4   : > { %2684 = vmatprep.subr.bf16.mxu1 %v3342_v2 }
 0x4c7   : > { %2685 = vmatpush3.bf16.msra.mxu1 %v2964_v61 }
 0x4c8   : > { %2686 = vmatprep.subr.bf16.mxu1 %v3342_v2 }
 0x4cb   : > { %2687 = vmatpush3.bf16.msra.mxu1 %v2965_v62 }
 0x4cc   : > { %2688 = vmatprep.subr.bf16.mxu1 %v3342_v2 }
 0x4cf   : > { %2689 = vmatpush3.bf16.msra.mxu1 %v2966_v63 }
 0x4d0   : > { %2690 = vmatprep.subr.bf16.mxu1 %v3342_v2 }
 0x4d3   : > { %2691 = vmatpush3.bf16.msra.mxu1 %v2967_v0 }
 0x4d4   : > { %2692 = vmatprep.subr.bf16.mxu1 %v3342_v2 }
 0x4d7   : > { %2693 = vmatpush3.bf16.msra.mxu1 %v2968_v1 }
 0x4d8   : > { %2694 = vmatprep.subr.bf16.mxu1 %v3342_v2 }
 0x4db   : > { %2695 = vmatpush3.bf16.msra.mxu1 %v2969_v3  ;;  %v2989_v3 = vld [vmem:[#allocation15 + $0x28] sm:$0xff]  }
 0x4dc   : > { %2696 = vmatprep.subr.bf16.mxu1 %v3342_v2 }
 0x4df   : > { %2697 = vmatpush3.bf16.msra.mxu1 %v2970_v5  ;;  %v2992_v5 = vld [vmem:[#allocation15 + $0x10] sm:$0xff]  }
 0x4e0   : > { %2708 = vmatprep.subr.bf16.mxu1 %v3342_v2 }
 0x4e2   : > { %2699 = vmatmul.mubr.bf16.vlgmr.msra.gmra.mxu1 %v1422_v6  ;;  %v2993_v6 = vld [vmem:[#allocation15 + $0x8] sm:$0xff]  }
 0x4e3   : > { %2724 = vmatprep.mubr.msk.bf16.mxu1 %vm3343_vm0, %v3342_v2  ;;  %2709 = vmatpush3.bf16.msra.mxu1 %v2987_v37 }
 0x4e4   : > { %2710 = vmatprep.subr.bf16.mxu1 %v3342_v2 }
 0x4e7   : > { %2711 = vmatpush3.bf16.msra.mxu1 %v2988_v60 }
 0x4e8   : > { %2712 = vmatprep.subr.bf16.mxu1 %v3342_v2 }
 0x4eb   : > { %2713 = vmatpush3.bf16.msra.mxu1 %v2989_v3 }
 0x4ec   : > { %2714 = vmatprep.subr.bf16.mxu1 %v3342_v2 }
 0x529   : > { %v1582_v8 = vpop.f32.mrf.mxu1 }
 0x52a   : > { %v1588_v44 = vpack.c.bf16 %v1582_v8, %v1582_v8  ;;  %v2994_v8 = vld [vmem:[#allocation15] sm:$0xff]  }
 0x52b   : > { %v2680_v9 = vpop.f32.mrf.mxu1 }
 0x52c   : > { %v2995_v9 = vld [vmem:[#allocation16 + $0x38] sm:$0xff]  }
 0x52d   : > { %v1585_v10 = vpop.f32.mrf.mxu1 }
 0x52e   : > { %v2996_v10 = vld [vmem:[#allocation16 + $0x30] sm:$0xff]  }
 0x52f   : > { %v2681_v11 = vpop.f32.mrf.mxu1 }
 0x530   : > { %v2997_v11 = vld [vmem:[#allocation16 + $0x28] sm:$0xff]  }
 0x5a2   : > { %v1688_v39 = vpop.f32.mrf.mxu1 }
 0x5a3   : > { %v1694_v41 = vsel %vm1527_vm3, %v1688_v39, -inf }
 0x5a4   : > { %1695 = vmax.xlane.f32.xlu1 %v1694_v41  ;;  %v2700_v7 = vpop.f32.mrf.mxu1  ;;  %v2999_v41 = vld [vmem:[#allocation16 + $0x18] sm:$0xff]  }
 0x5a5   : > { %v3000_v7 = vld [vmem:[#allocation16 + $0x10] sm:$0xff]  }
 0x5a6   : > { %v1691_v12 = vpop.f32.mrf.mxu1 }
 0x5a8   : > { %v2701_v13 = vpop.f32.mrf.mxu1 }
 0x62d   : > { %v1696_v14 = vpop.xlane.xlu1 %1695 }
 0x62e   : > { %v1697_v15 = vsub.f32 %v1688_v39, %v1696_v14  ;;  %v2998_v39 = vld [vmem:[#allocation16 + $0x20] sm:$0xff]  }
 0x630   : > { %v1698_v16 = vmul.f32 1.442695, %v1697_v15 }
 0x632   : > { %3007 = vpow2.f32 %v1698_v16  ;;  %v2536_v16 = vld [vmem:[%s3866_s10] ss:$0 sm:$0xff] }
 0x63f   : > { %v3008_v17 = vpop.eup %3007 }
 0x640   : > { %v1700_v18 = vsel %vm1527_vm3, %v3008_v17, 0.0 }
 0x641   : > { %1701 = vadd.xlane.f32.xlu0 %v1700_v18  ;;  %v2537_v18 = vld [vmem:[%s3867_s11] ss:$0 sm:$0xff] }
 0x6ca   : > { %v1702_v20 = vpop.xlane.xlu0 %1701 }
 0x6cb   : > { %3009 = vrcp.f32 %v1702_v20 }
 0x6d8   : > { %v3010_v21 = vpop.eup %3009 }
 0x6d9   : > { %v1704_v22 = vmul.f32 %v3010_v21, %v3008_v17 }
 0x6db   : > { %v1705_v24 = vpack.c.bf16 %v1704_v22, %v1704_v22  ;;  %v3001_v22 = vld [vmem:[#allocation16 + $0x8] sm:$0xff]  }
 0x6dd   : > { %2705 = vmatmul.mubr.msk.bf16.vlgmr.msra.gmra.mxu0 %vm1527_vm3, %v1705_v24  ;;  %v2538_v24 = vld [vmem:[%s3922_s14] ss:$0 sm:$0xff]  ;;  %s2234_s14 = scalar_lea.hbm %s3927_s26, %s2559_s18 }
 0x6de   : > { %2617 = vmatpush3.bf16.msra.mxu0 %v2972_v23  ;;  %v3002_v23 = vld [vmem:[#allocation16] sm:$0xff]  }
 0x6df   : > { %2618 = vmatprep.subr.bf16.mxu0 %v2973_v25 }
 0x6e2   : > { %2619 = vmatpush3.bf16.msra.mxu0 %v2974_v26 }
 0x6e3   : > { %2620 = vmatprep.subr.bf16.mxu0 %v2975_v27 }
 0x6e6   : > { %2621 = vmatpush3.bf16.msra.mxu0 %v2976_v28 }
 0x6e7   : > { %2622 = vmatprep.subr.bf16.mxu0 %v2977_v47 }
 0x6ea   : > { %2623 = vmatpush3.bf16.msra.mxu0 %v2978_v29 }
 0x6eb   : > { %2624 = vmatprep.subr.bf16.mxu0 %v2979_v30 }
 0x6ee   : > { %2625 = vmatpush3.bf16.msra.mxu0 %v2980_v31  ;;  %v2547_v31 = vld [vmem:[%s3923_s1] ss:$0 sm:$0xff]  ;;  %s3344_s1 = smov [#allocation18]  }
 0x6ef   : > { %2626 = vmatprep.subr.bf16.mxu0 %v2981_v32  ;;  %s3231_s8 = sshll.u32 %s3344_s1, 4  ;;  %s3232_s8 = int_to_ptr.vmem [resolvable:$false] %s3231_s8 }
 0x6f0   : > { %s3233_s17 = scalar_lea.vmem %s3232_s8, 256  ;;  %p3234_p12 = scmp.lt.s32.totalorder %s2237_s16, %s3232_s8 }
 0x6f1   : > { %p3235_p1 = scmp.lt.s32.totalorder %s3233_s17, %s3227_s21 }
 0x6f2   : > { %2627 = vmatpush3.bf16.msra.mxu0 %v2982_v33 }
 0x6f3   : > { %2628 = vmatprep.subr.bf16.mxu0 %v2983_v34  ;;  %p3236_p3 = por %p3235_p1, %p3234_p12 }
 0x6f5   : > { %p3237_p13 = pnand %p3236_p3, %p3230_p8 }
 0x6f6   : > { %2629 = vmatpush3.bf16.msra.mxu0 %v2984_v36 }
 0x6f7   : > { %2630 = vmatprep.subr.bf16.mxu0 %v2985_v38 }
 0x6fa   : > { %2631 = vmatpush3.bf16.msra.mxu0 %v2986_v40 }
 0x6fb   : > { %2728 = vmatprep.subr.bf16.mxu0 %v3342_v2 }
 0x79d   : > { %v1748_v42 = vpop.f32.mrf.mxu0 }
 0x79e   : > { %v1754_v43 = vpack.c.bf16 %v1748_v42, %v1748_v42 }
 0x79f   : > { %v2706_v45 = vpop.f32.mrf.mxu0 }
 0x7a0   : > { %1922 = vmatprep.mubr.bf16.mxu0 %v1754_v43 }
 0x7a1   : > { %v1751_v46 = vpop.f32.mrf.mxu0  ;;  %1923 = vmatmul.mubr.bf16.vlgmr.msra.gmra.mxu0 %v1588_v44 }
 0x7a2   : > { %2744 = vmatprep.mubr.msk.bf16.mxu0 %vm3343_vm0, %v3342_v2  ;;  %2729 = vmatpush3.bf16.msra.mxu0 %v2995_v9 }
 0x7a3   : > { %v2707_v48 = vpop.f32.mrf.mxu0  ;;  %2730 = vmatprep.subr.bf16.mxu0 %v3342_v2 }
 0x7a6   : > { %2731 = vmatpush3.bf16.msra.mxu0 %v2996_v10 }
 0x7a7   : > { %2732 = vmatprep.subr.bf16.mxu0 %v3342_v2 }
 0x7aa   : > { %2733 = vmatpush3.bf16.msra.mxu0 %v2997_v11 }
 0x7ab   : > { %2734 = vmatprep.subr.bf16.mxu0 %v3342_v2 }
 0x7ae   : > { %2735 = vmatpush3.bf16.msra.mxu0 %v2998_v39 }
 0x7af   : > { %2736 = vmatprep.subr.bf16.mxu0 %v3342_v2 }
 0x7b2   : > { %2737 = vmatpush3.bf16.msra.mxu0 %v2999_v41 }
 0x7b3   : > { %2738 = vmatprep.subr.bf16.mxu0 %v3342_v2 }
 0x7b6   : > { %2739 = vmatpush3.bf16.msra.mxu0 %v3000_v7 }
 0x7b7   : > { %2740 = vmatprep.subr.bf16.mxu0 %v3342_v2 }
 0x7ba   : > { %2741 = vmatpush3.bf16.msra.mxu0 %v3001_v22 }
 0x7bb   : > { %2742 = vmatprep.subr.bf16.mxu0 %v3342_v2 }
 0x7be   : > { %2743 = vmatpush3.bf16.msra.mxu0 %v3002_v23 }
 0x861   : > { %v2632_v50 = vpop.f32.mrf.mxu0 }
 0x863   : > { %v2633_v52 = vpop.f32.mrf.mxu0 }
 0x864   : > { %v2634_v53 = vadd.f32 %v2633_v52, %v2632_v50  ;;  %v2556_v52 = vld [vmem:[%s3925_s2] ss:$0 sm:$0xff] }
 0x865   : > { %v2635_v54 = vpop.f32.mrf.mxu0 }
 0x866   : > { %v1925_v55 = vadd.f32 %v2634_v53, %v2518_v51  ;;  %v2557_v54 = vld [vmem:[%s3926_s15] ss:$0 sm:$0xff] }
 0x867   : > { %v2636_v56 = vpop.f32.mrf.mxu0 }
 0x868   : > { %v1935_v58 = vadd.f32 %v1925_v55, %v3663_v35  ;;  %v2990_v35 = vld [vmem:[#allocation15 + $0x20] sm:$0xff]  }
 0x869   : > { %2715 = vmatpush3.bf16.msra.mxu1 %v2990_v35 }
 0x86a   : > { %v1938_v59 = vmul.f32 %v3776_v57, %v1935_v58  ;;  %2716 = vmatprep.subr.bf16.mxu1 %v3342_v2 }
 0x86c   : > { %1939 = vadd.xlane.f32.xlu0 %v1938_v59 }
 0x86d   : > { %2717 = vmatpush3.bf16.msra.mxu1 %v2991_v4 }
 0x86e   : > { %2718 = vmatprep.subr.bf16.mxu1 %v3342_v2 }
 0x871   : > { %2719 = vmatpush3.bf16.msra.mxu1 %v2992_v5 }
 0x872   : > { %2720 = vmatprep.subr.bf16.mxu1 %v3342_v2 }
 0x875   : > { %2721 = vmatpush3.bf16.msra.mxu1 %v2993_v6 }
 0x876   : > { %2722 = vmatprep.subr.bf16.mxu1 %v3342_v2 }
 0x879   : > { %2723 = vmatpush3.bf16.msra.mxu1 %v2994_v8 }
 0x8f5   : > { %v1940_v61 = vpop.xlane.xlu0 %1939 }
 0x8f6   : > { %v1941_v62 = vmul.f32 0.03125, %v1940_v61 }
 0x8f8   : > { %v1942_v63 = vsub.f32 %v1938_v59, %v1941_v62 }
 0x8fa   : > { %v1943_v0 = vmul.f32 %v3776_v57, %v1942_v63 }
 0x8fc   : > { %v1944_v1 = vmul.f32 %v1943_v0, %v1943_v0 }
 0x8fe   : > { %1945 = vadd.xlane.f32.xlu0 %v1944_v1 }
 0x987   : > { %v1946_v12 = vpop.xlane.xlu0 %1945 }
 0x988   : > { %v1947_v13 = vmul.f32 0.03125, %v1946_v12 }
 0x98a   : > { %v1948_v14 = vadd.f32 1e-06, %v1947_v13 }
 0x98c   : > { %3011 = vrsqrt.f32 %v1948_v14 }
 0x999   : > { %v3012_v15 = vpop.eup %3011 }
 0x99a   : > { %v1950_v17 = vmul.f32 %v3012_v15, %v1943_v0 }
 0x99c   : > { %v1957_v19 = vmul.f32 %v2536_v16, %v1950_v17 }
 0x99e   : > { %v1964_v20 = vadd.f32 %v2537_v18, %v1957_v19 }
 0x9a0   : > { %v1965_v21 = vpack.c.bf16 %v1964_v20, %v1964_v20 }
 0x9a2   : > { %2725 = vmatmul.mubr.bf16.vlgmr.msra.gmra.mxu1 %v1965_v21 }
 0xa62   : > { %v2071_v25 = vpop.f32.mrf.mxu1 }
 0xa63   : > { %v2072_v26 = vadd.f32 %v2538_v24, %v2071_v25 }
 0xa64   : > { %v2726_v27 = vpop.f32.mrf.mxu1 }
 0xa65   : > { %v2077_v28 = vmax.f32 %v2072_v26, 0.0 }
 0xa66   : > { %v2074_v47 = vpop.f32.mrf.mxu1 }
 0xa67   : > { %v2078_v29 = vpack.c.bf16 %v2077_v28, %v2077_v28 }
 0xa68   : > { %v2727_v30 = vpop.f32.mrf.mxu1 }
 0xa69   : > { %2745 = vmatmul.mubr.bf16.vlgmr.msra.gmra.mxu0 %v2078_v29 }
 0xb29   : > { %v2184_v32 = vpop.f32.mrf.mxu0 }
 0xb2a   : > { %v2185_v2 = vadd.f32 %v2547_v31, %v2184_v32 }
 0xb2b   : > { %v2746_v33 = vpop.f32.mrf.mxu0 }
 0xb2c   : > { %v2190_v34 = vadd.f32 %v2185_v2, %v1964_v20 }
 0xb2d   : > { %v2187_v36 = vpop.f32.mrf.mxu0 }
 0xb2e   : > { %v2193_v38 = vmul.f32 %v3776_v57, %v2190_v34 }
 0xb2f   : > { %v2747_v40 = vpop.f32.mrf.mxu0 }
 0xb30   : > { %2194 = vadd.xlane.f32.xlu0 %v2193_v38 }
 0xbb9   : > { %v2195_v42 = vpop.xlane.xlu0 %2194 }
 0xbba   : > { %v2196_v43 = vmul.f32 0.03125, %v2195_v42 }
 0xbbc   : > { %v2197_v44 = vsub.f32 %v2193_v38, %v2196_v43 }
 0xbbe   : > { %v2198_v45 = vmul.f32 %v3776_v57, %v2197_v44 }
 0xbc0   : > { %v2199_v46 = vmul.f32 %v2198_v45, %v2198_v45 }
 0xbc2   : > { %2200 = vadd.xlane.f32.xlu0 %v2199_v46 }
 0xc4b   : > { %v2201_v48 = vpop.xlane.xlu0 %2200 }
 0xc4c   : > { %v2202_v49 = vmul.f32 0.03125, %v2201_v48 }
 0xc4e   : > { %v2203_v50 = vadd.f32 1e-06, %v2202_v49 }
 0xc50   : > { %3013 = vrsqrt.f32 %v2203_v50 }
 0xc5d   : > { %v3014_v51 = vpop.eup %3013 }
 0xc5e   : > { %v2205_v53 = vmul.f32 %v3014_v51, %v2198_v45 }
 0xc60   : > { %v2212_v55 = vmul.f32 %v2556_v52, %v2205_v53 }
 0xc62   : > { %v2219_v56 = vadd.f32 %v2557_v54, %v2212_v55 }
 0xc64   : > { %2220 = vst [vmem:[%s731_s30] sm:$0xff] %v2219_v56 }
 0xc65   : > { %3240 = shalt.err (!%p3237_p13)
}
 0xc66   : > { %s3241_s12 = scalar_lea.hbm %s2234_s14, 128  ;;  %s3245_s2 = scalar_lea.hbm %s3927_s26, 256 }
 0xc67   : > { %p3242_p2 = scmp.ne.s32.totalorder %s2234_s14, %s3241_s12  ;;  %p3246_p10 = scmp.lt.s32.totalorder %s2234_s14, %s3927_s26 }
 0xc68   : > { %p3247_p6 = scmp.lt.s32.totalorder %s3245_s2, %s3241_s12 }
 0xc69   : > { %p3243_p7 = pnand %p3242_p2, %p3578_p11 }
 0xc6a   : > { %p3248_p5 = por %p3247_p6, %p3246_p10 }
 0xc6b   : > { %p3244_p9 = pneg %p3243_p7 }
 0xc6d   : > { %p3249_p4 = pnand %p3248_p5, %p3244_p9 }
 0xc6f   : > { %3252 = shalt.err (!%p3249_p4)
}
 0xc70   : > { %2776 = dma.vmem_to_hbm [thread:$0]  (%p3578_p11), %s2237_s16, 128, %s2234_s14, %s2222_s20  }
 0xc71 PF: > { %s2248_s15 = sand.u32 1, %s3307_s27   ;;  %p3928_p8 = scmp.ge.s32.totalorder %s3327_s19, 2 }
 0xc72   : > { %s2249_s18 = scalar_lea.sflag [#allocation6], %s2248_s15 }
 0xc73   : > { %p2805_p12 = pnand %p3928_p8, %p3585_p0 }
 0xc75   : > { %p2806_p1 = pneg %p2805_p12 }
 0xc77   : > { %3302 = dma.done.wait (%p2806_p1), %s2249_s18, 128  }
 0xc78   : > { %3304 = vsyncadd (%p2806_p1), %s2249_s18, 4294967168  ;;  %s40_s19 = sadd.s32 1, %s3327_s19   ;;  %s3929_s30 = sld [smem:[#allocation29_spill]] }
 0xc79   : > { %p37_p3 = scmp.ge.s32.totalorder %s40_s19, 4   ;;  %s3930_s23 = sld [smem:[#allocation27_spill]] }
 0xc7a   : > { %s3931_s0 = sld [smem:[#allocation28_spill]]  ;;  %s3932_s27 = smov %s3311_s28 }
 0xc7b   : > { %s3933_s28 = smov %s3315_s29  ;;  %39 = sbr.rel (!%p37_p3) target bundleno = 25 (0x19), region = 182 }
 0xc7e   : > { %s3934_s29 = smov %s3929_s30 }
 0xc7f   : > { %s3935_s30 = smov %s3930_s23 }
 0xc80   :  { %2254 = vsyncpa [#allocation5], 1 }
 0xc81   :  { %2256 = vsyncpa [#allocation5 + $0x1], 1 }
 0xc82   :  { %2257 = vsyncpa [#allocation8], 1 }
 0xc83   :  { %2259 = vsyncpa [#allocation8 + $0x1], 1 }
 0xc84   :  { %2260 = vsyncpa [#allocation11], 1 }
 0xc85   :  { %2261 = vsyncpa [#allocation14], 1 }
 0xc86   :  { %2262 = vsyncpa [#allocation17], 1 }
 0xc87   :  { %2263 = vsyncpa [#allocation6], 1 }
 0xc88   :  { %2265 = vsyncpa [#allocation6 + $0x1], 1 }

</bundles_post_ra>
